<compile_context>
chip_gen: v7x
topology: tpu7x:2x2x1
jax: 0.10.0
libtpu: 0.0.40
codegen_flags: <defaults>
</compile_context>

<pallas_src>
import functools

import jax
import jax.numpy as jnp
from jax import lax
from jax.experimental import pallas as pl
from jax.experimental.pallas import tpu as pltpu


# ----------------------------------------------------------------------------
# Fully fused forward kernel (single grid step; everything stays on-chip)
# ----------------------------------------------------------------------------
def prgat_kernel(x_ref, adj_ref, logc_ref,
                 wr0_ref, br0_ref, wr1_ref, br1_ref,
                 wg0_ref, ad0_ref, as0_ref, bg0_ref,
                 wg1_ref, ad1_ref, as1_ref, bg1_ref,
                 wgo_ref, ado_ref, aso_ref, bgo_ref,
                 o_ref, *, n_rel, heads, neg_slope):
    adj = adj_ref[...]      # (R, N, N) mean-normalized per-relation adjacency
    logc = logc_ref[...]    # (N, N) log(edge count) for real edges, -1e30 otherwise
                            # (every row has a self loop -> softmax is safe)

    def rgcn(xin, w_all, bias):
        # out = sum_r (A_r @ X) @ W_r + X @ W_root + b
        # == concat([A_0@X, ..., A_{R-1}@X, X], -1) @ [W_0;...;W_{R-1};W_root]
        parts = [jnp.dot(adj[r], xin, preferred_element_type=jnp.float32)
                 for r in range(n_rel)]
        parts.append(xin)
        z = jnp.concatenate(parts, axis=-1)                 # (N, (R+1)*F_in)
        out = jnp.dot(z, w_all, preferred_element_type=jnp.float32) + bias
        return jnp.maximum(out, 0.0)                        # ReLU activation

    def gat(xin, w_cat, adst_blk, asrc_blk, bias, apply_relu):
        # e[i,j] = leaky_relu(<a_dst, xh[i]> + <a_src, xh[j]>) + log(cnt[i,j])
        fo = w_cat.shape[1] // heads
        xh_all = jnp.dot(xin, w_cat, preferred_element_type=jnp.float32)  # (N,H*F)
        a_dst = jnp.dot(xh_all, adst_blk,
                        preferred_element_type=jnp.float32)               # (N, H)
        a_src_t = lax.dot_general(asrc_blk, xh_all,
                                  (((0,), (1,)), ((), ())),
                                  preferred_element_type=jnp.float32)     # (H, N)
        outs = []
        for h in range(heads):
            e = a_dst[:, h:h + 1] + a_src_t[h:h + 1, :]                   # (N, N)
            e = jnp.maximum(e, 0.0) + neg_slope * jnp.minimum(e, 0.0)     # leaky
            e = e + logc                      # mask + duplicate-edge weight folded
            e = e - jnp.max(e, axis=-1, keepdims=True)
            p = jnp.exp(e)
            inv = pl.reciprocal(jnp.sum(p, axis=-1, keepdims=True), approx=True)
            xh_h = xh_all[:, h * fo:(h + 1) * fo]
            outs.append(jnp.dot(p * inv, xh_h, preferred_element_type=jnp.float32))
        out = jnp.concatenate(outs, axis=-1) + bias          # (N, H*F) single store
        if apply_relu:
            out = jnp.maximum(out, 0.0)
        return out

    x = x_ref[...]
    # RGCN input layer + 1 hidden RGCN layer (dropout p=0.0 -> identity)
    x = rgcn(x, wr0_ref[...], br0_ref[...])
    x = rgcn(x, wr1_ref[...], br1_ref[...])
    # 2 hidden GAT layers (concat heads) + GAT output layer (no activation)
    x = gat(x, wg0_ref[...], ad0_ref[...], as0_ref[...], bg0_ref[...], True)
    x = gat(x, wg1_ref[...], ad1_ref[...], as1_ref[...], bg1_ref[...], True)
    x = gat(x, wgo_ref[...], ado_ref[...], aso_ref[...], bgo_ref[...], False)
    # final head: logits = tanh(mean(x, axis=1, keepdims=True))
    o_ref[...] = jnp.tanh(jnp.mean(x, axis=1, keepdims=True))


def _full_spec(shape):
    nd = len(shape)
    return pl.BlockSpec(shape, lambda *_, nd=nd: (0,) * nd)


def prgat_forward(x, adj_norm, log_cnt, params, neg_slope):
    n = x.shape[0]
    n_rel = adj_norm.shape[0]
    heads = params["heads"]

    wr0, br0 = params["rgcn0"]
    wr1, br1 = params["rgcn1"]
    wg0, ad0, as0, bg0 = params["gat0"]
    wg1, ad1, as1, bg1 = params["gat1"]
    wgo, ado, aso, bgo = params["gat_out"]
    args = [x, adj_norm, log_cnt,
            wr0, br0, wr1, br1,
            wg0, ad0, as0, bg0,
            wg1, ad1, as1, bg1,
            wgo, ado, aso, bgo]

    kernel = functools.partial(prgat_kernel, n_rel=n_rel, heads=heads,
                               neg_slope=neg_slope)
    return pl.pallas_call(
        kernel,
        out_shape=jax.ShapeDtypeStruct((n, 1), jnp.float32),
        grid=(1,),
        in_specs=[_full_spec(a.shape) for a in args],
        out_specs=_full_spec((n, 1)),
        compiler_params=pltpu.CompilerParams(
            dimension_semantics=("arbitrary",)),
    )(*args)


# ----------------------------------------------------------------------------
# Parameter init (deterministic, synthetic) in kernel-friendly prestacked layout
# ----------------------------------------------------------------------------
def init_rgcn(key, f_in, f_out, n_rel, n_bases):
    k1, k2, k3, k4 = jax.random.split(key, 4)
    basis = jax.random.normal(k1, (n_bases, f_in, f_out), jnp.float32) / jnp.sqrt(f_in)
    comp = jax.random.normal(k2, (n_rel, n_bases), jnp.float32) / jnp.sqrt(n_bases)
    root = jax.random.normal(k3, (f_in, f_out), jnp.float32) / jnp.sqrt(f_in)
    bias = jax.random.normal(k4, (f_out,), jnp.float32) * 0.01
    w_rel = jnp.einsum("rb,bio->rio", comp, basis)          # basis decomposition
    # stacked weight: [W_0; ...; W_{R-1}; W_root]  -> ((R+1)*F_in, F_out)
    w_all = jnp.concatenate([w_rel.reshape(n_rel * f_in, f_out), root], axis=0)
    return w_all, bias.reshape(1, f_out)


def init_gat(key, f_in, f_out, heads):
    k1, k2, k3, k4 = jax.random.split(key, 4)
    w = jax.random.normal(k1, (heads, f_in, f_out), jnp.float32) / jnp.sqrt(f_in)
    att_src = jax.random.normal(k2, (heads, f_out), jnp.float32) / jnp.sqrt(f_out)
    att_dst = jax.random.normal(k3, (heads, f_out), jnp.float32) / jnp.sqrt(f_out)
    bias = jax.random.normal(k4, (heads * f_out,), jnp.float32) * 0.01
    # head-concatenated weight: column block h == W_h  -> (f_in, heads*f_out)
    w_cat = jnp.transpose(w, (1, 0, 2)).reshape(f_in, heads * f_out)
    # block-diagonal attention vectors -> (heads*f_out, heads)
    adst_blk = jnp.zeros((heads * f_out, heads), jnp.float32)
    asrc_blk = jnp.zeros((heads * f_out, heads), jnp.float32)
    for h in range(heads):
        adst_blk = adst_blk.at[h * f_out:(h + 1) * f_out, h].set(att_dst[h])
        asrc_blk = asrc_blk.at[h * f_out:(h + 1) * f_out, h].set(att_src[h])
    return w_cat, adst_blk, asrc_blk, bias.reshape(1, heads * f_out)


if __name__ == "__main__":
    # Model hyper-params (small, consistent with the module's constructor)
    N = 16            # nodes
    F_IN = 8          # num_features
    N_CLASSES = 4
    N_REL = 3         # num_rels
    N_BASES = 2       # num_bases
    HID = 16          # num_hidden = [16, 16, 16, 16]
    HEADS = 2         # num_heads for the GAT layers
    N_EDGES = 40
    NEG_SLOPE = 0.2

    key = jax.random.PRNGKey(0)
    ks = jax.random.split(key, 10)

    # Graph data (data.x, data.edge_index, data.edge_type)
    x = jax.random.normal(ks[0], (N, F_IN), jnp.float32)
    src = jax.random.randint(ks[1], (N_EDGES,), 0, N)
    dst = jax.random.randint(ks[2], (N_EDGES,), 0, N)
    etype = jax.random.randint(ks[3], (N_EDGES,), 0, N_REL)

    # Dense per-relation adjacency (dst, src), mean-normalized (RGCN aggr='mean')
    A = jnp.zeros((N_REL, N, N), jnp.float32).at[etype, dst, src].add(1.0)
    deg = A.sum(axis=-1, keepdims=True)
    adj_norm = A / jnp.maximum(deg, 1.0)

    # GAT edge counts: drop self loops, add exactly one self loop per node.
    # Fold the edge mask + duplicate-edge multiplicity into one additive bias:
    #   logc = log(count) for real edges, -1e30 for non-edges.
    C = A.sum(axis=0)
    C = C * (1.0 - jnp.eye(N, dtype=jnp.float32)) + jnp.eye(N, dtype=jnp.float32)
    log_cnt = jnp.where(C > 0.0, jnp.log(jnp.maximum(C, 1e-30)), -1e30)

    # Parameters (prestacked / head-concatenated on the host)
    params = {
        "heads":   HEADS,
        "rgcn0":   init_rgcn(ks[4], F_IN, HID, N_REL, N_BASES),
        "rgcn1":   init_rgcn(ks[5], HID, HID, N_REL, N_BASES),
        "gat0":    init_gat(ks[6], HID, HID, HEADS),                 # 16 -> 16x2
        "gat1":    init_gat(ks[7], HID * HEADS, HID, HEADS),         # 32 -> 16x2
        "gat_out": init_gat(ks[8], HID * HEADS, N_CLASSES, HEADS),   # 32 -> 4x2
    }

    out = prgat_forward(x, adj_norm, log_cnt, params, NEG_SLOPE)
    out = jax.block_until_ready(out)
    assert out.shape == (N, 1) and bool(jnp.all(jnp.isfinite(out)))
    print("KERNEL_OK")
</pallas_src>

<mosaic_0001>
module attributes {stable_mosaic.version = 11 : i64} {
  func.func @prgat_kernel(%arg0: i32, %arg1: memref<16x8xf32, #tpu.memory_space<vmem>>, %arg2: memref<3x16x16xf32, #tpu.memory_space<vmem>>, %arg3: memref<16x16xf32, #tpu.memory_space<vmem>>, %arg4: memref<32x16xf32, #tpu.memory_space<vmem>>, %arg5: memref<1x16xf32, #tpu.memory_space<vmem>>, %arg6: memref<64x16xf32, #tpu.memory_space<vmem>>, %arg7: memref<1x16xf32, #tpu.memory_space<vmem>>, %arg8: memref<16x32xf32, #tpu.memory_space<vmem>>, %arg9: memref<32x2xf32, #tpu.memory_space<vmem>>, %arg10: memref<32x2xf32, #tpu.memory_space<vmem>>, %arg11: memref<1x32xf32, #tpu.memory_space<vmem>>, %arg12: memref<32x32xf32, #tpu.memory_space<vmem>>, %arg13: memref<32x2xf32, #tpu.memory_space<vmem>>, %arg14: memref<32x2xf32, #tpu.memory_space<vmem>>, %arg15: memref<1x32xf32, #tpu.memory_space<vmem>>, %arg16: memref<32x8xf32, #tpu.memory_space<vmem>>, %arg17: memref<8x2xf32, #tpu.memory_space<vmem>>, %arg18: memref<8x2xf32, #tpu.memory_space<vmem>>, %arg19: memref<1x8xf32, #tpu.memory_space<vmem>>, %arg20: memref<16x1xf32, #tpu.memory_space<vmem>>) attributes {dimension_semantics = [#tpu.dimension_semantics<arbitrary>], iteration_bounds = array<i64: 1>, scalar_prefetch = 0 : i64, scratch_operands = 0 : i64, tpu.core_type = #tpu.core_type<tc>, window_params = [{pipeline_mode = #tpu.pipeline_mode<synchronous>, transform_indices = @transform_0, window_bounds = array<i64: 16, 8>}, {pipeline_mode = #tpu.pipeline_mode<synchronous>, transform_indices = @transform_1, window_bounds = array<i64: 3, 16, 16>}, {pipeline_mode = #tpu.pipeline_mode<synchronous>, transform_indices = @transform_2, window_bounds = array<i64: 16, 16>}, {pipeline_mode = #tpu.pipeline_mode<synchronous>, transform_indices = @transform_3, window_bounds = array<i64: 32, 16>}, {pipeline_mode = #tpu.pipeline_mode<synchronous>, transform_indices = @transform_4, window_bounds = array<i64: 1, 16>}, {pipeline_mode = #tpu.pipeline_mode<synchronous>, transform_indices = @transform_5, window_bounds = array<i64: 64, 16>}, {pipeline_mode = #tpu.pipeline_mode<synchronous>, transform_indices = @transform_6, window_bounds = array<i64: 1, 16>}, {pipeline_mode = #tpu.pipeline_mode<synchronous>, transform_indices = @transform_7, window_bounds = array<i64: 16, 32>}, {pipeline_mode = #tpu.pipeline_mode<synchronous>, transform_indices = @transform_8, window_bounds = array<i64: 32, 2>}, {pipeline_mode = #tpu.pipeline_mode<synchronous>, transform_indices = @transform_9, window_bounds = array<i64: 32, 2>}, {pipeline_mode = #tpu.pipeline_mode<synchronous>, transform_indices = @transform_10, window_bounds = array<i64: 1, 32>}, {pipeline_mode = #tpu.pipeline_mode<synchronous>, transform_indices = @transform_11, window_bounds = array<i64: 32, 32>}, {pipeline_mode = #tpu.pipeline_mode<synchronous>, transform_indices = @transform_12, window_bounds = array<i64: 32, 2>}, {pipeline_mode = #tpu.pipeline_mode<synchronous>, transform_indices = @transform_13, window_bounds = array<i64: 32, 2>}, {pipeline_mode = #tpu.pipeline_mode<synchronous>, transform_indices = @transform_14, window_bounds = array<i64: 1, 32>}, {pipeline_mode = #tpu.pipeline_mode<synchronous>, transform_indices = @transform_15, window_bounds = array<i64: 32, 8>}, {pipeline_mode = #tpu.pipeline_mode<synchronous>, transform_indices = @transform_16, window_bounds = array<i64: 8, 2>}, {pipeline_mode = #tpu.pipeline_mode<synchronous>, transform_indices = @transform_17, window_bounds = array<i64: 8, 2>}, {pipeline_mode = #tpu.pipeline_mode<synchronous>, transform_indices = @transform_18, window_bounds = array<i64: 1, 8>}, {pipeline_mode = #tpu.pipeline_mode<synchronous>, transform_indices = @transform_19, window_bounds = array<i64: 16, 1>}]} {
    %c0 = arith.constant 0 : index
    %c0_0 = arith.constant 0 : index
    %c0_1 = arith.constant 0 : index
    %0 = vector.load %arg2[%c0, %c0_0, %c0_1] : memref<3x16x16xf32, #tpu.memory_space<vmem>>, vector<3x16x16xf32>
    %c0_2 = arith.constant 0 : index
    %c0_3 = arith.constant 0 : index
    %1 = vector.load %arg3[%c0_2, %c0_3] : memref<16x16xf32, #tpu.memory_space<vmem>>, vector<16x16xf32>
    %c0_4 = arith.constant 0 : index
    %c0_5 = arith.constant 0 : index
    %2 = vector.load %arg1[%c0_4, %c0_5] : memref<16x8xf32, #tpu.memory_space<vmem>>, vector<16x8xf32>
    %c0_6 = arith.constant 0 : index
    %c0_7 = arith.constant 0 : index
    %3 = vector.load %arg4[%c0_6, %c0_7] : memref<32x16xf32, #tpu.memory_space<vmem>>, vector<32x16xf32>
    %c0_8 = arith.constant 0 : index
    %c0_9 = arith.constant 0 : index
    %4 = vector.load %arg5[%c0_8, %c0_9] : memref<1x16xf32, #tpu.memory_space<vmem>>, vector<1x16xf32>
    %5 = vector.extract_strided_slice %0 {offsets = [0, 0, 0], sizes = [1, 16, 16], strides = [1, 1, 1]} : vector<3x16x16xf32> to vector<1x16x16xf32>
    %6 = vector.shape_cast %5 : vector<1x16x16xf32> to vector<16x16xf32>
    %cst = arith.constant dense<0.000000e+00> : vector<16x8xf32>
    %7 = tpu.matmul %6, %2, %cst {dimension_numbers = #tpu.dot_dimension_numbers<[1], [0], [0], [1], [0, 0, 1, 1], [], []>} : vector<16x16xf32>, vector<16x8xf32>, vector<16x8xf32> -> vector<16x8xf32>
    %8 = vector.extract_strided_slice %0 {offsets = [1, 0, 0], sizes = [1, 16, 16], strides = [1, 1, 1]} : vector<3x16x16xf32> to vector<1x16x16xf32>
    %9 = vector.shape_cast %8 : vector<1x16x16xf32> to vector<16x16xf32>
    %cst_10 = arith.constant dense<0.000000e+00> : vector<16x8xf32>
    %10 = tpu.matmul %9, %2, %cst_10 {dimension_numbers = #tpu.dot_dimension_numbers<[1], [0], [0], [1], [0, 0, 1, 1], [], []>} : vector<16x16xf32>, vector<16x8xf32>, vector<16x8xf32> -> vector<16x8xf32>
    %11 = vector.extract_strided_slice %0 {offsets = [2, 0, 0], sizes = [1, 16, 16], strides = [1, 1, 1]} : vector<3x16x16xf32> to vector<1x16x16xf32>
    %12 = vector.shape_cast %11 : vector<1x16x16xf32> to vector<16x16xf32>
    %cst_11 = arith.constant dense<0.000000e+00> : vector<16x8xf32>
    %13 = tpu.matmul %12, %2, %cst_11 {dimension_numbers = #tpu.dot_dimension_numbers<[1], [0], [0], [1], [0, 0, 1, 1], [], []>} : vector<16x16xf32>, vector<16x8xf32>, vector<16x8xf32> -> vector<16x8xf32>
    %14 = tpu.concatenate %7, %10, %13, %2 in 1 : vector<16x8xf32>, vector<16x8xf32>, vector<16x8xf32>, vector<16x8xf32> -> vector<16x32xf32>
    %cst_12 = arith.constant dense<0.000000e+00> : vector<16x16xf32>
    %15 = tpu.matmul %14, %3, %cst_12 {dimension_numbers = #tpu.dot_dimension_numbers<[1], [0], [0], [1], [0, 0, 1, 1], [], []>} : vector<16x32xf32>, vector<32x16xf32>, vector<16x16xf32> -> vector<16x16xf32>
    %16 = vector.broadcast %4 : vector<1x16xf32> to vector<16x16xf32>
    %17 = arith.addf %15, %16 : vector<16x16xf32>
    %cst_13 = arith.constant 0.000000e+00 : f32
    %18 = vector.broadcast %cst_13 : f32 to vector<16x16xf32>
    %19 = arith.maximumf %17, %18 : vector<16x16xf32>
    %c0_14 = arith.constant 0 : index
    %c0_15 = arith.constant 0 : index
    %20 = vector.load %arg6[%c0_14, %c0_15] : memref<64x16xf32, #tpu.memory_space<vmem>>, vector<64x16xf32>
    %c0_16 = arith.constant 0 : index
    %c0_17 = arith.constant 0 : index
    %21 = vector.load %arg7[%c0_16, %c0_17] : memref<1x16xf32, #tpu.memory_space<vmem>>, vector<1x16xf32>
    %22 = vector.extract_strided_slice %0 {offsets = [0, 0, 0], sizes = [1, 16, 16], strides = [1, 1, 1]} : vector<3x16x16xf32> to vector<1x16x16xf32>
    %23 = vector.shape_cast %22 : vector<1x16x16xf32> to vector<16x16xf32>
    %cst_18 = arith.constant dense<0.000000e+00> : vector<16x16xf32>
    %24 = tpu.matmul %23, %19, %cst_18 {dimension_numbers = #tpu.dot_dimension_numbers<[1], [0], [0], [1], [0, 0, 1, 1], [], []>} : vector<16x16xf32>, vector<16x16xf32>, vector<16x16xf32> -> vector<16x16xf32>
    %25 = vector.extract_strided_slice %0 {offsets = [1, 0, 0], sizes = [1, 16, 16], strides = [1, 1, 1]} : vector<3x16x16xf32> to vector<1x16x16xf32>
    %26 = vector.shape_cast %25 : vector<1x16x16xf32> to vector<16x16xf32>
    %cst_19 = arith.constant dense<0.000000e+00> : vector<16x16xf32>
    %27 = tpu.matmul %26, %19, %cst_19 {dimension_numbers = #tpu.dot_dimension_numbers<[1], [0], [0], [1], [0, 0, 1, 1], [], []>} : vector<16x16xf32>, vector<16x16xf32>, vector<16x16xf32> -> vector<16x16xf32>
    %28 = vector.extract_strided_slice %0 {offsets = [2, 0, 0], sizes = [1, 16, 16], strides = [1, 1, 1]} : vector<3x16x16xf32> to vector<1x16x16xf32>
    %29 = vector.shape_cast %28 : vector<1x16x16xf32> to vector<16x16xf32>
    %cst_20 = arith.constant dense<0.000000e+00> : vector<16x16xf32>
    %30 = tpu.matmul %29, %19, %cst_20 {dimension_numbers = #tpu.dot_dimension_numbers<[1], [0], [0], [1], [0, 0, 1, 1], [], []>} : vector<16x16xf32>, vector<16x16xf32>, vector<16x16xf32> -> vector<16x16xf32>
    %31 = tpu.concatenate %24, %27, %30, %19 in 1 : vector<16x16xf32>, vector<16x16xf32>, vector<16x16xf32>, vector<16x16xf32> -> vector<16x64xf32>
    %cst_21 = arith.constant dense<0.000000e+00> : vector<16x16xf32>
    %32 = tpu.matmul %31, %20, %cst_21 {dimension_numbers = #tpu.dot_dimension_numbers<[1], [0], [0], [1], [0, 0, 1, 1], [], []>} : vector<16x64xf32>, vector<64x16xf32>, vector<16x16xf32> -> vector<16x16xf32>
    %33 = vector.broadcast %21 : vector<1x16xf32> to vector<16x16xf32>
    %34 = arith.addf %32, %33 : vector<16x16xf32>
    %cst_22 = arith.constant 0.000000e+00 : f32
    %35 = vector.broadcast %cst_22 : f32 to vector<16x16xf32>
    %36 = arith.maximumf %34, %35 : vector<16x16xf32>
    %c0_23 = arith.constant 0 : index
    %c0_24 = arith.constant 0 : index
    %37 = vector.load %arg8[%c0_23, %c0_24] : memref<16x32xf32, #tpu.memory_space<vmem>>, vector<16x32xf32>
    %c0_25 = arith.constant 0 : index
    %c0_26 = arith.constant 0 : index
    %38 = vector.load %arg9[%c0_25, %c0_26] : memref<32x2xf32, #tpu.memory_space<vmem>>, vector<32x2xf32>
    %c0_27 = arith.constant 0 : index
    %c0_28 = arith.constant 0 : index
    %39 = vector.load %arg10[%c0_27, %c0_28] : memref<32x2xf32, #tpu.memory_space<vmem>>, vector<32x2xf32>
    %c0_29 = arith.constant 0 : index
    %c0_30 = arith.constant 0 : index
    %40 = vector.load %arg11[%c0_29, %c0_30] : memref<1x32xf32, #tpu.memory_space<vmem>>, vector<1x32xf32>
    %cst_31 = arith.constant dense<0.000000e+00> : vector<16x32xf32>
    %41 = tpu.matmul %36, %37, %cst_31 {dimension_numbers = #tpu.dot_dimension_numbers<[1], [0], [0], [1], [0, 0, 1, 1], [], []>} : vector<16x16xf32>, vector<16x32xf32>, vector<16x32xf32> -> vector<16x32xf32>
    %cst_32 = arith.constant dense<0.000000e+00> : vector<16x2xf32>
    %42 = tpu.matmul %41, %38, %cst_32 {dimension_numbers = #tpu.dot_dimension_numbers<[1], [0], [0], [1], [0, 0, 1, 1], [], []>} : vector<16x32xf32>, vector<32x2xf32>, vector<16x2xf32> -> vector<16x2xf32>
    %cst_33 = arith.constant dense<0.000000e+00> : vector<2x16xf32>
    %43 = tpu.matmul %39, %41, %cst_33 {dimension_numbers = #tpu.dot_dimension_numbers<[0], [1], [1], [0], [0, 1, 1, 0], [], []>} : vector<32x2xf32>, vector<16x32xf32>, vector<2x16xf32> -> vector<2x16xf32>
    %44 = vector.extract_strided_slice %42 {offsets = [0, 0], sizes = [16, 1], strides = [1, 1]} : vector<16x2xf32> to vector<16x1xf32>
    %45 = vector.extract_strided_slice %43 {offsets = [0, 0], sizes = [1, 16], strides = [1, 1]} : vector<2x16xf32> to vector<1x16xf32>
    %46 = vector.broadcast %44 : vector<16x1xf32> to vector<16x16xf32>
    %47 = vector.broadcast %45 : vector<1x16xf32> to vector<16x16xf32>
    %48 = arith.addf %46, %47 : vector<16x16xf32>
    %cst_34 = arith.constant 0.000000e+00 : f32
    %49 = vector.broadcast %cst_34 : f32 to vector<16x16xf32>
    %50 = arith.maximumf %48, %49 : vector<16x16xf32>
    %cst_35 = arith.constant 0.000000e+00 : f32
    %51 = vector.broadcast %cst_35 : f32 to vector<16x16xf32>
    %52 = arith.minimumf %48, %51 : vector<16x16xf32>
    %cst_36 = arith.constant 2.000000e-01 : f32
    %53 = vector.broadcast %cst_36 : f32 to vector<16x16xf32>
    %54 = arith.mulf %53, %52 : vector<16x16xf32>
    %55 = arith.addf %50, %54 : vector<16x16xf32>
    %56 = arith.addf %55, %1 : vector<16x16xf32>
    %cst_37 = arith.constant dense<0xFF800000> : vector<16xf32>
    %57 = vector.multi_reduction <maximumf>, %56, %cst_37 [1] : vector<16x16xf32> to vector<16xf32>
    %58 = vector.shape_cast %57 : vector<16xf32> to vector<16x1xf32>
    %59 = vector.broadcast %58 : vector<16x1xf32> to vector<16x16xf32>
    %60 = arith.subf %56, %59 : vector<16x16xf32>
    %61 = math.exp %60 : vector<16x16xf32>
    %cst_38 = arith.constant dense<0.000000e+00> : vector<16xf32>
    %62 = vector.multi_reduction <add>, %61, %cst_38 [1] : vector<16x16xf32> to vector<16xf32>
    %63 = vector.shape_cast %62 : vector<16xf32> to vector<16x1xf32>
    %64 = tpu.reciprocal %63 {approx = true} : vector<16x1xf32> -> vector<16x1xf32>
    %65 = vector.extract_strided_slice %41 {offsets = [0, 0], sizes = [16, 16], strides = [1, 1]} : vector<16x32xf32> to vector<16x16xf32>
    %66 = vector.broadcast %64 : vector<16x1xf32> to vector<16x16xf32>
    %67 = arith.mulf %61, %66 : vector<16x16xf32>
    %cst_39 = arith.constant dense<0.000000e+00> : vector<16x16xf32>
    %68 = tpu.matmul %67, %65, %cst_39 {dimension_numbers = #tpu.dot_dimension_numbers<[1], [0], [0], [1], [0, 0, 1, 1], [], []>} : vector<16x16xf32>, vector<16x16xf32>, vector<16x16xf32> -> vector<16x16xf32>
    %69 = vector.extract_strided_slice %42 {offsets = [0, 1], sizes = [16, 1], strides = [1, 1]} : vector<16x2xf32> to vector<16x1xf32>
    %70 = vector.extract_strided_slice %43 {offsets = [1, 0], sizes = [1, 16], strides = [1, 1]} : vector<2x16xf32> to vector<1x16xf32>
    %71 = vector.broadcast %69 : vector<16x1xf32> to vector<16x16xf32>
    %72 = vector.broadcast %70 : vector<1x16xf32> to vector<16x16xf32>
    %73 = arith.addf %71, %72 : vector<16x16xf32>
    %cst_40 = arith.constant 0.000000e+00 : f32
    %74 = vector.broadcast %cst_40 : f32 to vector<16x16xf32>
    %75 = arith.maximumf %73, %74 : vector<16x16xf32>
    %cst_41 = arith.constant 0.000000e+00 : f32
    %76 = vector.broadcast %cst_41 : f32 to vector<16x16xf32>
    %77 = arith.minimumf %73, %76 : vector<16x16xf32>
    %cst_42 = arith.constant 2.000000e-01 : f32
    %78 = vector.broadcast %cst_42 : f32 to vector<16x16xf32>
    %79 = arith.mulf %78, %77 : vector<16x16xf32>
    %80 = arith.addf %75, %79 : vector<16x16xf32>
    %81 = arith.addf %80, %1 : vector<16x16xf32>
    %cst_43 = arith.constant dense<0xFF800000> : vector<16xf32>
    %82 = vector.multi_reduction <maximumf>, %81, %cst_43 [1] : vector<16x16xf32> to vector<16xf32>
    %83 = vector.shape_cast %82 : vector<16xf32> to vector<16x1xf32>
    %84 = vector.broadcast %83 : vector<16x1xf32> to vector<16x16xf32>
    %85 = arith.subf %81, %84 : vector<16x16xf32>
    %86 = math.exp %85 : vector<16x16xf32>
    %cst_44 = arith.constant dense<0.000000e+00> : vector<16xf32>
    %87 = vector.multi_reduction <add>, %86, %cst_44 [1] : vector<16x16xf32> to vector<16xf32>
    %88 = vector.shape_cast %87 : vector<16xf32> to vector<16x1xf32>
    %89 = tpu.reciprocal %88 {approx = true} : vector<16x1xf32> -> vector<16x1xf32>
    %90 = vector.extract_strided_slice %41 {offsets = [0, 16], sizes = [16, 16], strides = [1, 1]} : vector<16x32xf32> to vector<16x16xf32>
    %91 = vector.broadcast %89 : vector<16x1xf32> to vector<16x16xf32>
    %92 = arith.mulf %86, %91 : vector<16x16xf32>
    %cst_45 = arith.constant dense<0.000000e+00> : vector<16x16xf32>
    %93 = tpu.matmul %92, %90, %cst_45 {dimension_numbers = #tpu.dot_dimension_numbers<[1], [0], [0], [1], [0, 0, 1, 1], [], []>} : vector<16x16xf32>, vector<16x16xf32>, vector<16x16xf32> -> vector<16x16xf32>
    %94 = tpu.concatenate %68, %93 in 1 : vector<16x16xf32>, vector<16x16xf32> -> vector<16x32xf32>
    %95 = vector.broadcast %40 : vector<1x32xf32> to vector<16x32xf32>
    %96 = arith.addf %94, %95 : vector<16x32xf32>
    %cst_46 = arith.constant 0.000000e+00 : f32
    %97 = vector.broadcast %cst_46 : f32 to vector<16x32xf32>
    %98 = arith.maximumf %96, %97 : vector<16x32xf32>
    %c0_47 = arith.constant 0 : index
    %c0_48 = arith.constant 0 : index
    %99 = vector.load %arg12[%c0_47, %c0_48] : memref<32x32xf32, #tpu.memory_space<vmem>>, vector<32x32xf32>
    %c0_49 = arith.constant 0 : index
    %c0_50 = arith.constant 0 : index
    %100 = vector.load %arg13[%c0_49, %c0_50] : memref<32x2xf32, #tpu.memory_space<vmem>>, vector<32x2xf32>
    %c0_51 = arith.constant 0 : index
    %c0_52 = arith.constant 0 : index
    %101 = vector.load %arg14[%c0_51, %c0_52] : memref<32x2xf32, #tpu.memory_space<vmem>>, vector<32x2xf32>
    %c0_53 = arith.constant 0 : index
    %c0_54 = arith.constant 0 : index
    %102 = vector.load %arg15[%c0_53, %c0_54] : memref<1x32xf32, #tpu.memory_space<vmem>>, vector<1x32xf32>
    %cst_55 = arith.constant dense<0.000000e+00> : vector<16x32xf32>
    %103 = tpu.matmul %98, %99, %cst_55 {dimension_numbers = #tpu.dot_dimension_numbers<[1], [0], [0], [1], [0, 0, 1, 1], [], []>} : vector<16x32xf32>, vector<32x32xf32>, vector<16x32xf32> -> vector<16x32xf32>
    %cst_56 = arith.constant dense<0.000000e+00> : vector<16x2xf32>
    %104 = tpu.matmul %103, %100, %cst_56 {dimension_numbers = #tpu.dot_dimension_numbers<[1], [0], [0], [1], [0, 0, 1, 1], [], []>} : vector<16x32xf32>, vector<32x2xf32>, vector<16x2xf32> -> vector<16x2xf32>
    %cst_57 = arith.constant dense<0.000000e+00> : vector<2x16xf32>
    %105 = tpu.matmul %101, %103, %cst_57 {dimension_numbers = #tpu.dot_dimension_numbers<[0], [1], [1], [0], [0, 1, 1, 0], [], []>} : vector<32x2xf32>, vector<16x32xf32>, vector<2x16xf32> -> vector<2x16xf32>
    %106 = vector.extract_strided_slice %104 {offsets = [0, 0], sizes = [16, 1], strides = [1, 1]} : vector<16x2xf32> to vector<16x1xf32>
    %107 = vector.extract_strided_slice %105 {offsets = [0, 0], sizes = [1, 16], strides = [1, 1]} : vector<2x16xf32> to vector<1x16xf32>
    %108 = vector.broadcast %106 : vector<16x1xf32> to vector<16x16xf32>
    %109 = vector.broadcast %107 : vector<1x16xf32> to vector<16x16xf32>
    %110 = arith.addf %108, %109 : vector<16x16xf32>
    %cst_58 = arith.constant 0.000000e+00 : f32
    %111 = vector.broadcast %cst_58 : f32 to vector<16x16xf32>
    %112 = arith.maximumf %110, %111 : vector<16x16xf32>
    %cst_59 = arith.constant 0.000000e+00 : f32
    %113 = vector.broadcast %cst_59 : f32 to vector<16x16xf32>
    %114 = arith.minimumf %110, %113 : vector<16x16xf32>
    %cst_60 = arith.constant 2.000000e-01 : f32
    %115 = vector.broadcast %cst_60 : f32 to vector<16x16xf32>
    %116 = arith.mulf %115, %114 : vector<16x16xf32>
    %117 = arith.addf %112, %116 : vector<16x16xf32>
    %118 = arith.addf %117, %1 : vector<16x16xf32>
    %cst_61 = arith.constant dense<0xFF800000> : vector<16xf32>
    %119 = vector.multi_reduction <maximumf>, %118, %cst_61 [1] : vector<16x16xf32> to vector<16xf32>
    %120 = vector.shape_cast %119 : vector<16xf32> to vector<16x1xf32>
    %121 = vector.broadcast %120 : vector<16x1xf32> to vector<16x16xf32>
    %122 = arith.subf %118, %121 : vector<16x16xf32>
    %123 = math.exp %122 : vector<16x16xf32>
    %cst_62 = arith.constant dense<0.000000e+00> : vector<16xf32>
    %124 = vector.multi_reduction <add>, %123, %cst_62 [1] : vector<16x16xf32> to vector<16xf32>
    %125 = vector.shape_cast %124 : vector<16xf32> to vector<16x1xf32>
    %126 = tpu.reciprocal %125 {approx = true} : vector<16x1xf32> -> vector<16x1xf32>
    %127 = vector.extract_strided_slice %103 {offsets = [0, 0], sizes = [16, 16], strides = [1, 1]} : vector<16x32xf32> to vector<16x16xf32>
    %128 = vector.broadcast %126 : vector<16x1xf32> to vector<16x16xf32>
    %129 = arith.mulf %123, %128 : vector<16x16xf32>
    %cst_63 = arith.constant dense<0.000000e+00> : vector<16x16xf32>
    %130 = tpu.matmul %129, %127, %cst_63 {dimension_numbers = #tpu.dot_dimension_numbers<[1], [0], [0], [1], [0, 0, 1, 1], [], []>} : vector<16x16xf32>, vector<16x16xf32>, vector<16x16xf32> -> vector<16x16xf32>
    %131 = vector.extract_strided_slice %104 {offsets = [0, 1], sizes = [16, 1], strides = [1, 1]} : vector<16x2xf32> to vector<16x1xf32>
    %132 = vector.extract_strided_slice %105 {offsets = [1, 0], sizes = [1, 16], strides = [1, 1]} : vector<2x16xf32> to vector<1x16xf32>
    %133 = vector.broadcast %131 : vector<16x1xf32> to vector<16x16xf32>
    %134 = vector.broadcast %132 : vector<1x16xf32> to vector<16x16xf32>
    %135 = arith.addf %133, %134 : vector<16x16xf32>
    %cst_64 = arith.constant 0.000000e+00 : f32
    %136 = vector.broadcast %cst_64 : f32 to vector<16x16xf32>
    %137 = arith.maximumf %135, %136 : vector<16x16xf32>
    %cst_65 = arith.constant 0.000000e+00 : f32
    %138 = vector.broadcast %cst_65 : f32 to vector<16x16xf32>
    %139 = arith.minimumf %135, %138 : vector<16x16xf32>
    %cst_66 = arith.constant 2.000000e-01 : f32
    %140 = vector.broadcast %cst_66 : f32 to vector<16x16xf32>
    %141 = arith.mulf %140, %139 : vector<16x16xf32>
    %142 = arith.addf %137, %141 : vector<16x16xf32>
    %143 = arith.addf %142, %1 : vector<16x16xf32>
    %cst_67 = arith.constant dense<0xFF800000> : vector<16xf32>
    %144 = vector.multi_reduction <maximumf>, %143, %cst_67 [1] : vector<16x16xf32> to vector<16xf32>
    %145 = vector.shape_cast %144 : vector<16xf32> to vector<16x1xf32>
    %146 = vector.broadcast %145 : vector<16x1xf32> to vector<16x16xf32>
    %147 = arith.subf %143, %146 : vector<16x16xf32>
    %148 = math.exp %147 : vector<16x16xf32>
    %cst_68 = arith.constant dense<0.000000e+00> : vector<16xf32>
    %149 = vector.multi_reduction <add>, %148, %cst_68 [1] : vector<16x16xf32> to vector<16xf32>
    %150 = vector.shape_cast %149 : vector<16xf32> to vector<16x1xf32>
    %151 = tpu.reciprocal %150 {approx = true} : vector<16x1xf32> -> vector<16x1xf32>
    %152 = vector.extract_strided_slice %103 {offsets = [0, 16], sizes = [16, 16], strides = [1, 1]} : vector<16x32xf32> to vector<16x16xf32>
    %153 = vector.broadcast %151 : vector<16x1xf32> to vector<16x16xf32>
    %154 = arith.mulf %148, %153 : vector<16x16xf32>
    %cst_69 = arith.constant dense<0.000000e+00> : vector<16x16xf32>
    %155 = tpu.matmul %154, %152, %cst_69 {dimension_numbers = #tpu.dot_dimension_numbers<[1], [0], [0], [1], [0, 0, 1, 1], [], []>} : vector<16x16xf32>, vector<16x16xf32>, vector<16x16xf32> -> vector<16x16xf32>
    %156 = tpu.concatenate %130, %155 in 1 : vector<16x16xf32>, vector<16x16xf32> -> vector<16x32xf32>
    %157 = vector.broadcast %102 : vector<1x32xf32> to vector<16x32xf32>
    %158 = arith.addf %156, %157 : vector<16x32xf32>
    %cst_70 = arith.constant 0.000000e+00 : f32
    %159 = vector.broadcast %cst_70 : f32 to vector<16x32xf32>
    %160 = arith.maximumf %158, %159 : vector<16x32xf32>
    %c0_71 = arith.constant 0 : index
    %c0_72 = arith.constant 0 : index
    %161 = vector.load %arg16[%c0_71, %c0_72] : memref<32x8xf32, #tpu.memory_space<vmem>>, vector<32x8xf32>
    %c0_73 = arith.constant 0 : index
    %c0_74 = arith.constant 0 : index
    %162 = vector.load %arg17[%c0_73, %c0_74] : memref<8x2xf32, #tpu.memory_space<vmem>>, vector<8x2xf32>
    %c0_75 = arith.constant 0 : index
    %c0_76 = arith.constant 0 : index
    %163 = vector.load %arg18[%c0_75, %c0_76] : memref<8x2xf32, #tpu.memory_space<vmem>>, vector<8x2xf32>
    %c0_77 = arith.constant 0 : index
    %c0_78 = arith.constant 0 : index
    %164 = vector.load %arg19[%c0_77, %c0_78] : memref<1x8xf32, #tpu.memory_space<vmem>>, vector<1x8xf32>
    %cst_79 = arith.constant dense<0.000000e+00> : vector<16x8xf32>
    %165 = tpu.matmul %160, %161, %cst_79 {dimension_numbers = #tpu.dot_dimension_numbers<[1], [0], [0], [1], [0, 0, 1, 1], [], []>} : vector<16x32xf32>, vector<32x8xf32>, vector<16x8xf32> -> vector<16x8xf32>
    %cst_80 = arith.constant dense<0.000000e+00> : vector<16x2xf32>
    %166 = tpu.matmul %165, %162, %cst_80 {dimension_numbers = #tpu.dot_dimension_numbers<[1], [0], [0], [1], [0, 0, 1, 1], [], []>} : vector<16x8xf32>, vector<8x2xf32>, vector<16x2xf32> -> vector<16x2xf32>
    %cst_81 = arith.constant dense<0.000000e+00> : vector<2x16xf32>
    %167 = tpu.matmul %163, %165, %cst_81 {dimension_numbers = #tpu.dot_dimension_numbers<[0], [1], [1], [0], [0, 1, 1, 0], [], []>} : vector<8x2xf32>, vector<16x8xf32>, vector<2x16xf32> -> vector<2x16xf32>
    %168 = vector.extract_strided_slice %166 {offsets = [0, 0], sizes = [16, 1], strides = [1, 1]} : vector<16x2xf32> to vector<16x1xf32>
    %169 = vector.extract_strided_slice %167 {offsets = [0, 0], sizes = [1, 16], strides = [1, 1]} : vector<2x16xf32> to vector<1x16xf32>
    %170 = vector.broadcast %168 : vector<16x1xf32> to vector<16x16xf32>
    %171 = vector.broadcast %169 : vector<1x16xf32> to vector<16x16xf32>
    %172 = arith.addf %170, %171 : vector<16x16xf32>
    %cst_82 = arith.constant 0.000000e+00 : f32
    %173 = vector.broadcast %cst_82 : f32 to vector<16x16xf32>
    %174 = arith.maximumf %172, %173 : vector<16x16xf32>
    %cst_83 = arith.constant 0.000000e+00 : f32
    %175 = vector.broadcast %cst_83 : f32 to vector<16x16xf32>
    %176 = arith.minimumf %172, %175 : vector<16x16xf32>
    %cst_84 = arith.constant 2.000000e-01 : f32
    %177 = vector.broadcast %cst_84 : f32 to vector<16x16xf32>
    %178 = arith.mulf %177, %176 : vector<16x16xf32>
    %179 = arith.addf %174, %178 : vector<16x16xf32>
    %180 = arith.addf %179, %1 : vector<16x16xf32>
    %cst_85 = arith.constant dense<0xFF800000> : vector<16xf32>
    %181 = vector.multi_reduction <maximumf>, %180, %cst_85 [1] : vector<16x16xf32> to vector<16xf32>
    %182 = vector.shape_cast %181 : vector<16xf32> to vector<16x1xf32>
    %183 = vector.broadcast %182 : vector<16x1xf32> to vector<16x16xf32>
    %184 = arith.subf %180, %183 : vector<16x16xf32>
    %185 = math.exp %184 : vector<16x16xf32>
    %cst_86 = arith.constant dense<0.000000e+00> : vector<16xf32>
    %186 = vector.multi_reduction <add>, %185, %cst_86 [1] : vector<16x16xf32> to vector<16xf32>
    %187 = vector.shape_cast %186 : vector<16xf32> to vector<16x1xf32>
    %188 = tpu.reciprocal %187 {approx = true} : vector<16x1xf32> -> vector<16x1xf32>
    %189 = vector.extract_strided_slice %165 {offsets = [0, 0], sizes = [16, 4], strides = [1, 1]} : vector<16x8xf32> to vector<16x4xf32>
    %190 = vector.broadcast %188 : vector<16x1xf32> to vector<16x16xf32>
    %191 = arith.mulf %185, %190 : vector<16x16xf32>
    %cst_87 = arith.constant dense<0.000000e+00> : vector<16x4xf32>
    %192 = tpu.matmul %191, %189, %cst_87 {dimension_numbers = #tpu.dot_dimension_numbers<[1], [0], [0], [1], [0, 0, 1, 1], [], []>} : vector<16x16xf32>, vector<16x4xf32>, vector<16x4xf32> -> vector<16x4xf32>
    %193 = vector.extract_strided_slice %166 {offsets = [0, 1], sizes = [16, 1], strides = [1, 1]} : vector<16x2xf32> to vector<16x1xf32>
    %194 = vector.extract_strided_slice %167 {offsets = [1, 0], sizes = [1, 16], strides = [1, 1]} : vector<2x16xf32> to vector<1x16xf32>
    %195 = vector.broadcast %193 : vector<16x1xf32> to vector<16x16xf32>
    %196 = vector.broadcast %194 : vector<1x16xf32> to vector<16x16xf32>
    %197 = arith.addf %195, %196 : vector<16x16xf32>
    %cst_88 = arith.constant 0.000000e+00 : f32
    %198 = vector.broadcast %cst_88 : f32 to vector<16x16xf32>
    %199 = arith.maximumf %197, %198 : vector<16x16xf32>
    %cst_89 = arith.constant 0.000000e+00 : f32
    %200 = vector.broadcast %cst_89 : f32 to vector<16x16xf32>
    %201 = arith.minimumf %197, %200 : vector<16x16xf32>
    %cst_90 = arith.constant 2.000000e-01 : f32
    %202 = vector.broadcast %cst_90 : f32 to vector<16x16xf32>
    %203 = arith.mulf %202, %201 : vector<16x16xf32>
    %204 = arith.addf %199, %203 : vector<16x16xf32>
    %205 = arith.addf %204, %1 : vector<16x16xf32>
    %cst_91 = arith.constant dense<0xFF800000> : vector<16xf32>
    %206 = vector.multi_reduction <maximumf>, %205, %cst_91 [1] : vector<16x16xf32> to vector<16xf32>
    %207 = vector.shape_cast %206 : vector<16xf32> to vector<16x1xf32>
    %208 = vector.broadcast %207 : vector<16x1xf32> to vector<16x16xf32>
    %209 = arith.subf %205, %208 : vector<16x16xf32>
    %210 = math.exp %209 : vector<16x16xf32>
    %cst_92 = arith.constant dense<0.000000e+00> : vector<16xf32>
    %211 = vector.multi_reduction <add>, %210, %cst_92 [1] : vector<16x16xf32> to vector<16xf32>
    %212 = vector.shape_cast %211 : vector<16xf32> to vector<16x1xf32>
    %213 = tpu.reciprocal %212 {approx = true} : vector<16x1xf32> -> vector<16x1xf32>
    %214 = vector.extract_strided_slice %165 {offsets = [0, 4], sizes = [16, 4], strides = [1, 1]} : vector<16x8xf32> to vector<16x4xf32>
    %215 = vector.broadcast %213 : vector<16x1xf32> to vector<16x16xf32>
    %216 = arith.mulf %210, %215 : vector<16x16xf32>
    %cst_93 = arith.constant dense<0.000000e+00> : vector<16x4xf32>
    %217 = tpu.matmul %216, %214, %cst_93 {dimension_numbers = #tpu.dot_dimension_numbers<[1], [0], [0], [1], [0, 0, 1, 1], [], []>} : vector<16x16xf32>, vector<16x4xf32>, vector<16x4xf32> -> vector<16x4xf32>
    %218 = tpu.concatenate %192, %217 in 1 : vector<16x4xf32>, vector<16x4xf32> -> vector<16x8xf32>
    %219 = vector.broadcast %164 : vector<1x8xf32> to vector<16x8xf32>
    %220 = arith.addf %218, %219 : vector<16x8xf32>
    %cst_94 = arith.constant dense<0.000000e+00> : vector<16xf32>
    %221 = vector.multi_reduction <add>, %220, %cst_94 [1] : vector<16x8xf32> to vector<16xf32>
    %222 = vector.shape_cast %221 : vector<16xf32> to vector<16x1xf32>
    %cst_95 = arith.constant 8.000000e+00 : f32
    %223 = vector.broadcast %cst_95 : f32 to vector<16x1xf32>
    %224 = arith.divf %222, %223 : vector<16x1xf32>
    %225 = math.tanh %224 : vector<16x1xf32>
    %c0_96 = arith.constant 0 : index
    %c0_97 = arith.constant 0 : index
    %226 = vector.load %arg20[%c0_96, %c0_97] : memref<16x1xf32, #tpu.memory_space<vmem>>, vector<16x1xf32>
    tpu.vector_store %arg20[%c0_96, %c0_97], %225 {strides = array<i32>} : memref<16x1xf32, #tpu.memory_space<vmem>>, vector<16x1xf32>,
    return
  }
  func.func @transform_0(%arg0: i32) -> (i32, i32) {
    %c0_i32 = arith.constant 0 : i32
    %c0_i32_0 = arith.constant 0 : i32
    %c0_i32_1 = arith.constant 0 : i32
    return %c0_i32, %c0_i32_0 : i32, i32
  }
  func.func @transform_1(%arg0: i32) -> (i32, i32, i32) {
    %c0_i32 = arith.constant 0 : i32
    %c0_i32_0 = arith.constant 0 : i32
    %c0_i32_1 = arith.constant 0 : i32
    %c0_i32_2 = arith.constant 0 : i32
    return %c0_i32, %c0_i32_0, %c0_i32_1 : i32, i32, i32
  }
  func.func @transform_2(%arg0: i32) -> (i32, i32) {
    %c0_i32 = arith.constant 0 : i32
    %c0_i32_0 = arith.constant 0 : i32
    %c0_i32_1 = arith.constant 0 : i32
    return %c0_i32, %c0_i32_0 : i32, i32
  }
  func.func @transform_3(%arg0: i32) -> (i32, i32) {
    %c0_i32 = arith.constant 0 : i32
    %c0_i32_0 = arith.constant 0 : i32
    %c0_i32_1 = arith.constant 0 : i32
    return %c0_i32, %c0_i32_0 : i32, i32
  }
  func.func @transform_4(%arg0: i32) -> (i32, i32) {
    %c0_i32 = arith.constant 0 : i32
    %c0_i32_0 = arith.constant 0 : i32
    %c0_i32_1 = arith.constant 0 : i32
    return %c0_i32, %c0_i32_0 : i32, i32
  }
  func.func @transform_5(%arg0: i32) -> (i32, i32) {
    %c0_i32 = arith.constant 0 : i32
    %c0_i32_0 = arith.constant 0 : i32
    %c0_i32_1 = arith.constant 0 : i32
    return %c0_i32, %c0_i32_0 : i32, i32
  }
  func.func @transform_6(%arg0: i32) -> (i32, i32) {
    %c0_i32 = arith.constant 0 : i32
    %c0_i32_0 = arith.constant 0 : i32
    %c0_i32_1 = arith.constant 0 : i32
    return %c0_i32, %c0_i32_0 : i32, i32
  }
  func.func @transform_7(%arg0: i32) -> (i32, i32) {
    %c0_i32 = arith.constant 0 : i32
    %c0_i32_0 = arith.constant 0 : i32
    %c0_i32_1 = arith.constant 0 : i32
    return %c0_i32, %c0_i32_0 : i32, i32
  }
  func.func @transform_8(%arg0: i32) -> (i32, i32) {
    %c0_i32 = arith.constant 0 : i32
    %c0_i32_0 = arith.constant 0 : i32
    %c0_i32_1 = arith.constant 0 : i32
    return %c0_i32, %c0_i32_0 : i32, i32
  }
  func.func @transform_9(%arg0: i32) -> (i32, i32) {
    %c0_i32 = arith.constant 0 : i32
    %c0_i32_0 = arith.constant 0 : i32
    %c0_i32_1 = arith.constant 0 : i32
    return %c0_i32, %c0_i32_0 : i32, i32
  }
  func.func @transform_10(%arg0: i32) -> (i32, i32) {
    %c0_i32 = arith.constant 0 : i32
    %c0_i32_0 = arith.constant 0 : i32
    %c0_i32_1 = arith.constant 0 : i32
    return %c0_i32, %c0_i32_0 : i32, i32
  }
  func.func @transform_11(%arg0: i32) -> (i32, i32) {
    %c0_i32 = arith.constant 0 : i32
    %c0_i32_0 = arith.constant 0 : i32
    %c0_i32_1 = arith.constant 0 : i32
    return %c0_i32, %c0_i32_0 : i32, i32
  }
  func.func @transform_12(%arg0: i32) -> (i32, i32) {
    %c0_i32 = arith.constant 0 : i32
    %c0_i32_0 = arith.constant 0 : i32
    %c0_i32_1 = arith.constant 0 : i32
    return %c0_i32, %c0_i32_0 : i32, i32
  }
  func.func @transform_13(%arg0: i32) -> (i32, i32) {
    %c0_i32 = arith.constant 0 : i32
    %c0_i32_0 = arith.constant 0 : i32
    %c0_i32_1 = arith.constant 0 : i32
    return %c0_i32, %c0_i32_0 : i32, i32
  }
  func.func @transform_14(%arg0: i32) -> (i32, i32) {
    %c0_i32 = arith.constant 0 : i32
    %c0_i32_0 = arith.constant 0 : i32
    %c0_i32_1 = arith.constant 0 : i32
    return %c0_i32, %c0_i32_0 : i32, i32
  }
  func.func @transform_15(%arg0: i32) -> (i32, i32) {
    %c0_i32 = arith.constant 0 : i32
    %c0_i32_0 = arith.constant 0 : i32
    %c0_i32_1 = arith.constant 0 : i32
    return %c0_i32, %c0_i32_0 : i32, i32
  }
  func.func @transform_16(%arg0: i32) -> (i32, i32) {
    %c0_i32 = arith.constant 0 : i32
    %c0_i32_0 = arith.constant 0 : i32
    %c0_i32_1 = arith.constant 0 : i32
    return %c0_i32, %c0_i32_0 : i32, i32
  }
  func.func @transform_17(%arg0: i32) -> (i32, i32) {
    %c0_i32 = arith.constant 0 : i32
    %c0_i32_0 = arith.constant 0 : i32
    %c0_i32_1 = arith.constant 0 : i32
    return %c0_i32, %c0_i32_0 : i32, i32
  }
  func.func @transform_18(%arg0: i32) -> (i32, i32) {
    %c0_i32 = arith.constant 0 : i32
    %c0_i32_0 = arith.constant 0 : i32
    %c0_i32_1 = arith.constant 0 : i32
    return %c0_i32, %c0_i32_0 : i32, i32
  }
  func.func @transform_19(%arg0: i32) -> (i32, i32) {
    %c0_i32 = arith.constant 0 : i32
    %c0_i32_0 = arith.constant 0 : i32
    %c0_i32_1 = arith.constant 0 : i32
    return %c0_i32, %c0_i32_0 : i32, i32
  }
}

</mosaic_0001>

<bundles_post_ra>
// kernel: tpu_custom_call.1
= control target key start
LH: loop header
LB: loop body
LE: loop exit
PB: predicated region body
PF: predicated region fallthrough
CT: control target
= control target key end

     0   :  { %vm77_vm0 = vcmask 130048   ;;  %s3048_s27 = smov 8   ;;  %s3049_s28 = smov 16   ;;  %vm345_vm1 = vcmask 64512   ;;  %vm350_vm2 = vcmask 195584   ;;  %vm359_vm3 = vcmask 261120   ;;  %s3512_s0 = inlined_call_operand.vmem [shape: f32[16,8], index: 0, kind: input, shape index: {}]   ;;  %s3513_s1 = inlined_call_operand.vmem [shape: f32[3,16,16], index: 1, kind: input, shape index: {}]   ;;  %s3514_s3 = inlined_call_operand.vmem [shape: f32[32,16], index: 3, kind: input, shape index: {}]   ;;  %s3515_s4 = inlined_call_operand.vmem [shape: f32[1,16], index: 4, kind: input, shape index: {}]   ;;  %s3516_s5 = inlined_call_operand.vmem [shape: f32[64,16], index: 5, kind: input, shape index: {}]   ;;  %s3517_s7 = inlined_call_operand.vmem [shape: f32[16,32], index: 7, kind: input, shape index: {}]   ;;  %s3518_s8 = inlined_call_operand.vmem [shape: f32[32,2], index: 8, kind: input, shape index: {}]   ;;  %s3519_s9 = inlined_call_operand.vmem [shape: f32[32,2], index: 9, kind: input, shape index: {}]   ;;  %s3520_s6 = inlined_call_operand.vmem [shape: f32[1,16], index: 6, kind: input, shape index: {}]   ;;  %s3521_s2 = inlined_call_operand.vmem [shape: f32[16,16], index: 2, kind: input, shape index: {}]   ;;  %s3522_s11 = inlined_call_operand.vmem [shape: f32[32,32], index: 11, kind: input, shape index: {}]   ;;  %s3523_s12 = inlined_call_operand.vmem [shape: f32[32,2], index: 12, kind: input, shape index: {}]   ;;  %s3524_s13 = inlined_call_operand.vmem [shape: f32[32,2], index: 13, kind: input, shape index: {}]   ;;  %s3525_s10 = inlined_call_operand.vmem [shape: f32[1,32], index: 10, kind: input, shape index: {}]   ;;  %s3526_s15 = inlined_call_operand.vmem [shape: f32[32,8], index: 15, kind: input, shape index: {}]   ;;  %s3527_s16 = inlined_call_operand.vmem [shape: f32[8,2], index: 16, kind: input, shape index: {}]   ;;  %s3528_s17 = inlined_call_operand.vmem [shape: f32[8,2], index: 17, kind: input, shape index: {}]   ;;  %s3529_s14 = inlined_call_operand.vmem [shape: f32[1,32], index: 14, kind: input, shape index: {}]   ;;  %s3530_s18 = inlined_call_operand.vmem [shape: f32[1,8], index: 18, kind: input, shape index: {}]   ;;  %s3531_s19 = inlined_call_operand.vmem [shape: f32[16,1], index: 19, kind: output, shape index: {}]  }
   0x1   :  { %3535 = sst [smem:[#allocation2_spill]] %s3512_s0  ;;  %s3050_s29 = smov 24   ;;  %v443_v41 = vld [vmem:[%s3516_s5] sm:$0xff]  ;;  %v444_v42 = vld [vmem:[%s3516_s5 + $0x8] sm:$0xff]  ;;  %v445_v44 = vld [vmem:[%s3516_s5 + $0x10] sm:$0xff]  ;;  %vm705_vm4 = vcmask 392192  }
   0x2   :  { %3536 = sst [smem:[#allocation3_spill]] %s3513_s1  ;;  %s3539_s20 = sld [smem:[#allocation2_spill]]  ;;  %v2874_v43 = vpack.c.bf16 %v444_v42, %v443_v41  ;;  %v446_v45 = vld [vmem:[%s3516_s5 + $0x18] sm:$0xff]  ;;  %v447_v47 = vld [vmem:[%s3516_s5 + $0x20] sm:$0xff]  ;;  %v448_v48 = vld [vmem:[%s3516_s5 + $0x28] sm:$0xff]  ;;  %vm714_vm5 = vcmask 523264   ;;  %v1086_v41 = vlaneseq }
   0x3   :  { %3537 = sst [smem:[#allocation4_spill]] %s3514_s3  ;;  %s3540_s23 = sld [smem:[#allocation3_spill]]  ;;  %v2878_v46 = vpack.c.bf16 %v446_v45, %v445_v44  ;;  %v2882_v49 = vpack.c.bf16 %v448_v48, %v447_v47  ;;  %v449_v50 = vld [vmem:[%s3516_s5 + $0x30] sm:$0xff]  ;;  %v450_v51 = vld [vmem:[%s3516_s5 + $0x38] sm:$0xff]  ;;  %vm3306_vm6 = vmpackc.low %vm359_vm3, %vm359_vm3  ;;  %vm3055_vm7 = vmmov 0   ;;  %vm2464_vm9 = vcmask 31744  }
   0x4   :  { %3538 = sst [smem:[#allocation5_spill]] %s3515_s4  ;;  %s3541_s22 = sld [smem:[#allocation4_spill]]  ;;  %v2886_v52 = vpack.c.bf16 %v450_v51, %v449_v50  ;;  %v1087_v42 = vshrl.u32 %v1086_v41, 7  ;;  %vm2952_vm8 = vmpackc.low %vm345_vm1, %vm345_vm1  ;;  %vm2486_vm10 = vcmask 7168  }
   0x5   :  { %s3052_s3 = smov 48  }
   0x6   :  { %v3327_v48 = vsub.s32 1, %v1087_v42 }
   0x8   :  { %v70_v0 = vld [vmem:[%s3539_s20] sm:$0xff]  ;;  %v71_v1 = vld [vmem:[%s3539_s20 + $0x8] sm:$0xff]  ;;  %s3542_s20 = sld [smem:[#allocation5_spill]] }
   0x9   :  { %v62_v2 = vld [vmem:[%s3540_s23] sm:$0xff]  ;;  %v2842_v3 = vpack.c.bf16 %v71_v1, %v70_v0  ;;  %v3174_v4 = vld [vmem:[%s3540_s23 + $0x10] sm:$0xff]  ;;  %v3181_v5 = vld [vmem:[%s3540_s23 + $0x8] sm:$0xff] }
   0xa   :  { %2655 = vmatprep.mubr.msk.f32.mxu0 %vm77_vm0, %v62_v2  ;;  %2662 = vmatprep.mubr.msk.f32.mxu1 %vm77_vm0, %v3174_v4  ;;  %v3186_v6 = vld [vmem:[%s3540_s23 + $0x18] sm:$0xff]  ;;  %v66_v7 = vld [vmem:[%s3540_s23 + $0x20] sm:$0xff]  ;;  %v67_v8 = vld [vmem:[%s3540_s23 + $0x28] sm:$0xff] }
   0xb   :  { %2843 = vmatprep.subr.bf16.mxu0 %v2842_v3  ;;  %2847 = vmatprep.subr.bf16.mxu1 %v2842_v3  ;;  %v72_v9 = vld [vmem:[%s3541_s22] sm:$0xff]  ;;  %v73_v10 = vld [vmem:[%s3541_s22 + $0x8] sm:$0xff]  ;;  %v74_v12 = vld [vmem:[%s3541_s22 + $0x10] sm:$0xff] }
   0xc   :  { %2845 = vmatpush3.bf16.msra.mxu0 %v2842_v3  ;;  %2849 = vmatpush3.bf16.msra.mxu1 %v2842_v3  ;;  %v2854_v11 = vpack.c.bf16 %v73_v10, %v72_v9  ;;  %v75_v13 = vld [vmem:[%s3541_s22 + $0x18] sm:$0xff]  ;;  %s3051_s22 = smov 32   ;;  %v800_v10 = vld [vmem:[%s3518_s8] sm:$0xff] }
   0xd   :  { %2851 = vmatprep.subr.bf16.mxu0 %v2842_v3  ;;  %v2858_v14 = vpack.c.bf16 %v75_v13, %v74_v12  ;;  %v804_v13 = vld [vmem:[%s3519_s9] sm:$0xff] }
   0xe   :  { %2855 = vmatprep.subr.bf16.mxu1 %v2854_v11  ;;  %v2499_v33 = vld [vmem:[%s3542_s20] ss:$0 sm:$0xff] }
   0xf   :  { %2656 = vmatmul.mubr.msk.f32.vlgmr.msra.gmra.mrb[0].mxu0 %vm77_vm0, %v3181_v5  ;;  %2663 = vmatmul.mubr.msk.f32.vlgmr.msra.gmra.mrb[0].mxu1 %vm77_vm0, %v3186_v6 }
  0x10   :  { %2853 = vmatpush3.bf16.msra.mxu0 %v2842_v3  ;;  %2669 = vmatprep.mubr.msk.f32.mxu0 %vm77_vm0, %v66_v7 }
  0x11   :  { %2857 = vmatpush3.bf16.msra.mxu1 %v2854_v11  ;;  %v801_v11 = vld [vmem:[%s3518_s8 + $0x8] sm:$0xff] }
  0x12   :  { %2859 = vmatprep.subr.bf16.mxu1 %v2858_v14  ;;  %v2894_v12 = vpack.c.bf16 %v801_v11, %v800_v10 }
  0x13   :  { %2670 = vmatmul.mubr.msk.f32.vlgmr.msra.gmra.mrb[2].mxu0 %vm77_vm0, %v67_v8 }
  0x14   :  { %2687 = vmatprep.mubr.msk.f32.mxu0 %vm77_vm0, %v62_v2 }
  0x15   :  { %2861 = vmatpush3.bf16.msra.mxu1 %v2858_v14  ;;  %v2508_v14 = vld [vmem:[%s3520_s6] ss:$0 sm:$0xff] }
  0xe2   :  { %v2657_v15 = vpop.f32.mrb[0].mxu0  ;;  %v2664_v16 = vpop.f32.mrb[0].mxu1 }
  0xe3   :  { %325 = vrot.lane.b32.xlu0 %v2664_v16, %s3048_s27  ;;  %v150_v17 = vpop.f32.mrb[1].mxu0  ;;  %v231_v18 = vpop.f32.mrb[1].mxu1 }
  0xe6   :  { %v2671_v19 = vpop.f32.mrb[2].mxu0 }
  0xe7   :  { %323 = vrot.lane.b32.xlu0 %v231_v18, %s3048_s27  ;;  %333 = vrot.lane.b32.xlu1 %v2671_v19, %s3049_s28  ;;  %v312_v20 = vpop.f32.mrb[3].mxu0  ;;  %v802_v19 = vld [vmem:[%s3518_s8 + $0x10] sm:$0xff] }
  0xeb   :  { %331 = vrot.lane.b32.xlu1 %v312_v20, %s3049_s28  ;;  %339 = vrot.lane.b32.xlu0 %v70_v0, %s3050_s29  ;;  %v803_v20 = vld [vmem:[%s3518_s8 + $0x18] sm:$0xff] }
  0xef   :  { %341 = vrot.lane.b32.xlu1 %v71_v1, %s3050_s29 }
 0x155   :  { %v326_v21 = vpop.permute.xlu0 %325 }
 0x156   :  { %v347_v29 = vsel %vm345_vm1, %v2657_v15, %v326_v21 }
 0x159   :  { %v324_v22 = vpop.permute.xlu0 %323  ;;  %v334_v23 = vpop.permute.xlu1 %333 }
 0x15a   :  { %v346_v24 = vsel %vm345_vm1, %v150_v17, %v324_v22  ;;  %v349_v30 = vsel %vm77_vm0, %v347_v29, %v334_v23  ;;  %v2898_v23 = vpack.c.bf16 %v803_v20, %v802_v19 }
 0x15d   :  { %v332_v25 = vpop.permute.xlu1 %331  ;;  %v340_v26 = vpop.permute.xlu0 %339 }
 0x15e   :  { %v348_v27 = vsel %vm77_vm0, %v346_v24, %v332_v25  ;;  %v3053_v24 = vmov 0.0|0.0   ;;  %v805_v25 = vld [vmem:[%s3519_s9 + $0x8] sm:$0xff] }
 0x15f   :  { %v351_v28 = vsel %vm350_vm2, %v348_v27, %v340_v26  ;;  %v806_v26 = vld [vmem:[%s3519_s9 + $0x10] sm:$0xff]  ;;  %v807_v27 = vld [vmem:[%s3519_s9 + $0x18] sm:$0xff] }
 0x160   :  { %2680 = vmatprep.mubr.msk.f32.mxu1 %vm359_vm3, %v351_v28  ;;  %v3054_v28 = vmov 0  }
 0x161   :  { %v342_v31 = vpop.permute.xlu1 %341  ;;  %2975 = vset.pattern.permute.xlu1 %v3054_v28 }
 0x162   :  { %v352_v32 = vsel %vm350_vm2, %v349_v30, %v342_v31 }
 0x163   :  { %2681 = vmatmul.mubr.msk.f32.vlgmr.msra.gmra.mrb[2].mxu1 %vm359_vm3, %v352_v32 }
 0x164   :  { %2701 = vmatprep.mubr.msk.f32.mxu1 %vm77_vm0, %v66_v7  ;;  %v798_v7 = vld [vmem:[%s3517_s7] sm:$0xff] }
 0x236   :  { %v2682_v34 = vpop.f32.mrb[2].mxu1 }
 0x237   :  { %v438_v35 = vadd.f32 %v2682_v34, %v2499_v33  ;;  %v432_v36 = vpop.f32.mrb[3].mxu1  ;;  %v3056_v34 = vmov 0.0  }
 0x238   :  { %v433_v37 = vadd.f32 %v2499_v33, %v432_v36 }
 0x239   :  { %v442_v38 = vmax.f32 %v438_v35, 0.0 }
 0x23a   :  { %v441_v39 = vmax.f32 %v433_v37, 0.0 }
 0x23c   :  { %v2862_v40 = vpack.c.bf16 %v442_v38, %v441_v39 }
 0x23e   :  { %2863 = vmatprep.subr.bf16.mxu0 %v2862_v40  ;;  %2871 = vmatprep.subr.bf16.mxu1 %v2862_v40 }
 0x23f   :  { %2865 = vmatpush3.bf16.msra.mxu0 %v2862_v40  ;;  %2873 = vmatpush3.bf16.msra.mxu1 %v2862_v40 }
 0x240   :  { %2867 = vmatprep.subr.bf16.mxu0 %v2862_v40 }
 0x242   :  { %2688 = vmatmul.mubr.msk.f32.vlgmr.msra.gmra.mrb[4].mxu0 %vm77_vm0, %v3181_v5  ;;  %2702 = vmatmul.mubr.msk.f32.vlgmr.msra.gmra.mrb[4].mxu1 %vm77_vm0, %v67_v8  ;;  %v799_v8 = vld [vmem:[%s3517_s7 + $0x8] sm:$0xff] }
 0x243   :  { %2869 = vmatpush3.bf16.msra.mxu0 %v2862_v40  ;;  %2694 = vmatprep.mubr.msk.f32.mxu0 %vm77_vm0, %v3174_v4  ;;  %v2890_v9 = vpack.c.bf16 %v799_v8, %v798_v7 }
 0x244   :  { %2875 = vmatprep.subr.bf16.mxu0 %v2874_v43 }
 0x245   :  { %2891 = vmatprep.subr.bf16.mxu1 %v2890_v9 }
 0x246   :  { %2695 = vmatmul.mubr.msk.f32.vlgmr.msra.gmra.mrb[6].mxu0 %vm77_vm0, %v3186_v6  ;;  %2893 = vmatpush3.bf16.msra.mxu1 %v2890_v9 }
 0x247   :  { %2877 = vmatpush3.bf16.msra.mxu0 %v2874_v43  ;;  %2895 = vmatprep.subr.bf16.mxu1 %v2894_v12  ;;  %v3324_v43 = vsub.s32 0, %v1087_v42 }
 0x248   :  { %2879 = vmatprep.subr.bf16.mxu0 %v2878_v46 }
 0x24b   :  { %2881 = vmatpush3.bf16.msra.mxu0 %v2878_v46 }
 0x24c   :  { %2883 = vmatprep.subr.bf16.mxu0 %v2882_v49 }
 0x24f   :  { %2885 = vmatpush3.bf16.msra.mxu0 %v2882_v49 }
 0x250   :  { %2887 = vmatprep.subr.bf16.mxu0 %v2886_v52 }
 0x253   :  { %2889 = vmatpush3.bf16.msra.mxu0 %v2886_v52 }
 0x315   :  { %v2689_v53 = vpop.f32.mrb[4].mxu0  ;;  %v2703_v54 = vpop.f32.mrb[4].mxu1 }
 0x316   :  { %689 = vrot.lane.b32.xlu1 %v2703_v54, %s3051_s22  ;;  %v518_v55 = vpop.f32.mrb[5].mxu0  ;;  %v668_v56 = vpop.f32.mrb[5].mxu1 }
 0x317   :  { %687 = vrot.lane.b32.xlu0 %v668_v56, %s3051_s22 }
 0x319   :  { %v2696_v57 = vpop.f32.mrb[6].mxu0 }
 0x31a   :  { %681 = vrot.lane.b32.xlu1 %v2696_v57, %s3049_s28  ;;  %v593_v58 = vpop.f32.mrb[7].mxu0 }
 0x31b   :  { %679 = vrot.lane.b32.xlu0 %v593_v58, %s3049_s28 }
 0x31e   :  { %697 = vrot.lane.b32.xlu1 %v442_v38, %s3052_s3 }
 0x31f   :  { %695 = vrot.lane.b32.xlu0 %v441_v39, %s3052_s3  ;;  %v3057_v39 = vmov 1  }
 0x33d   :  { %971 = vxpose.xlu0.b32.start [1/4] (short) (narrow) %v804_v13, 8 }
 0x341   :  { %972 = vxpose.xlu0.b32.cont [2/4] (short) (narrow) %v805_v25, 8 }
 0x345   :  { %973 = vxpose.xlu0.b32.cont [3/4] (short) (narrow) %v806_v26, 8 }
 0x349   :  { %974 = vxpose.xlu0.b32.end [4/4] (short) (narrow) %v807_v27, 8 }
 0x372   :  { %2982 = vset.pattern.permute.xlu0 %v3054_v28 }
 0x388   :  { %v690_v59 = vpop.permute.xlu1 %689 }
 0x389   :  { %v688_v60 = vpop.permute.xlu0 %687 }
 0x38c   :  { %v682_v61 = vpop.permute.xlu1 %681 }
 0x38d   :  { %v680_v62 = vpop.permute.xlu0 %679  ;;  %v702_v0 = vsel %vm77_vm0, %v2689_v53, %v682_v61  ;;  %v3332_v53 = vld [vmem:[%s3521_s2 + $0x8] sm:$0xff] }
 0x38e   :  { %v701_v63 = vsel %vm77_vm0, %v518_v55, %v680_v62  ;;  %v704_v4 = vsel %vm359_vm3, %v702_v0, %v690_v59  ;;  %v3339_v62 = vld [vmem:[%s3521_s2] sm:$0xff]  ;;  %s3058_s2 = smov 112  }
 0x38f   :  { %v703_v2 = vsel %vm359_vm3, %v701_v63, %v688_v60 }
 0x390   :  { %v698_v1 = vpop.permute.xlu1 %697 }
 0x391   :  { %v696_v3 = vpop.permute.xlu0 %695  ;;  %v707_v6 = vsel %vm705_vm4, %v704_v4, %v698_v1 }
 0x392   :  { %v706_v5 = vsel %vm705_vm4, %v703_v2, %v696_v3 }
 0x393   :  { %2720 = vmatprep.mubr.msk.f32.mxu0 %vm714_vm5, %v706_v5 }
 0x394   :  { %2721 = vmatmul.mubr.msk.f32.vlgmr.msra.gmra.mrb[8].mxu0 %vm714_vm5, %v707_v6 }
 0x3bd   :  { %v987_v35 = vpop.trf.xlu0 }
 0x467   :  { %v2722_v15 = vpop.f32.mrb[8].mxu0 }
 0x468   :  { %v793_v16 = vadd.f32 %v2722_v15, %v2508_v14  ;;  %v787_v17 = vpop.f32.mrb[9].mxu0 }
 0x469   :  { %v788_v18 = vadd.f32 %v2508_v14, %v787_v17 }
 0x46a   :  { %v797_v22 = vmax.f32 %v793_v16, 0.0 }
 0x46b   :  { %v796_v21 = vmax.f32 %v788_v18, 0.0 }
 0x46d   :  { %2727 = vmatprep.mubr.msk.f32.mxu1 %vm77_vm0, %v796_v21 }
 0x46e   :  { %2728 = vmatmul.mubr.msk.f32.vlgmr.msra.gmra.mrb[6].mxu1 %vm77_vm0, %v797_v22 }
 0x46f   :  { %2897 = vmatpush3.bf16.msra.mxu1 %v2894_v12 }
 0x470   :  { %2899 = vmatprep.subr.bf16.mxu1 %v2898_v23 }
 0x473   :  { %2901 = vmatpush3.bf16.msra.mxu1 %v2898_v23 }
 0x474   :  { %2902 = vmatprep.subr.bf16.mxu1 %v3053_v24 }
 0x541   :  { %v3300_v29 = vpop.f32.mrb[6].mxu1 }
 0x542   :  { %v3302_v30 = vpop.f32.mrb[7].mxu1 }
 0x543   :  { %v2977_v32 = vpack.i.bf16 %v3300_v29, %v3302_v30  ;;  %v2903_v33 = vpack.c.bf16 %v3300_v29, %v3302_v30  ;;  %2738 = vmatprep.mubr.msk.f32.mxu1 %vm359_vm3, %v3302_v30 }
 0x544   :  { %2739 = vmatmul.mubr.msk.f32.vlgmr.msra.gmra.mrb[8].mxu1 %vm359_vm3, %v3300_v29 }
 0x545   :  { %2905 = vmatpush3.bf16.xpose.msk.msra.mxu1 %vm3306_vm6, %v2903_v33  ;;  %2907 = vmatprep.subr.bf16.mxu0 %v2903_v33 }
 0x546   :  { %2909 = vmatpush3.bf16.msra.mxu0 %v2903_v33  ;;  %2745 = vmatprep.mubr.msk.f32.mxu1 %vm3055_vm7, %v3056_v34 }
 0x54c   :  { %2746 = vmatmul.mubr.msk.f32.vlgmr.msra.gmra.mrb[10].mxu1 %vm359_vm3, %v987_v35 }
 0x617   :  { %v2740_v36 = vpop.f32.mrb[8].mxu1 }
 0x618   :  { %1083 = vperm.xlu1 %2975, %v2740_v36   ;;  %v962_v37 = vpop.f32.mrb[9].mxu1 }
 0x61c   :  { %1078 = vperm.xlu1 %2975, %v962_v37  }
 0x61f   :  { %v1072_v38 = vpop.f32.mrb[10].mxu1 }
 0x620   :  { %2976 = vset.pattern.permute.xlu1 %v3057_v39  ;;  %v2747_v40 = vpop.f32.mrb[11].mxu1  ;;  %v1089_v44 = vrot.slane %v1072_v38, %v3324_v43  ;;  %v1216_v56 = vrot.slane %v1072_v38, %v3327_v48 }
 0x621   :  { %1206 = vperm.xlu1 %2976, %v962_v37  }
 0x625   :  { %1210 = vperm.xlu1 %2976, %v2740_v36  }
 0x697   :  { %v1084_v45 = vpop.permute.xlu1 %1083 }
 0x698   :  { %v1091_v46 = vadd.f32 %v1089_v44, %v1084_v45 }
 0x69a   :  { %v1095_v47 = vmin.f32 %v1091_v46, 0.0  ;;  %v1093_v50 = vmax.f32 %v1091_v46, 0.0 }
 0x69b   :  { %v1079_v49 = vpop.permute.xlu1 %1078 }
 0x69c   :  { %v1097_v51 = vmul.f32 0.2, %v1095_v47  ;;  %v1090_v52 = vadd.f32 %v1089_v44, %v1079_v49 }
 0x69e   :  { %v1094_v54 = vmin.f32 %v1090_v52, 0.0  ;;  %v1099_v55 = vadd.f32 %v1097_v51, %v1093_v50  ;;  %v1092_v57 = vmax.f32 %v1090_v52, 0.0 }
 0x6a0   :  { %v1096_v58 = vmul.f32 0.2, %v1094_v54  ;;  %v1207_v59 = vpop.permute.xlu1 %1206  ;;  %v1101_v60 = vadd.f32 %v1099_v55, %v3332_v53 }
 0x6a1   :  { %v1217_v61 = vadd.f32 %v1216_v56, %v1207_v59 }
 0x6a2   :  { %v1105_v63 = vsel %vm77_vm0, %v1101_v60, -inf  ;;  %v1098_v0 = vadd.f32 %v1096_v58, %v1092_v57 }
 0x6a3   :  { %v1221_v1 = vmin.f32 %v1217_v61, 0.0  ;;  %1106 = vmax.xlane.f32.xlu0 %v1105_v63  ;;  %v1219_v4 = vmax.f32 %v1217_v61, 0.0  ;;  %v1358_v61 = vld [vmem:[%s3522_s11] sm:$0xff]  ;;  %v1359_v63 = vld [vmem:[%s3522_s11 + $0x8] sm:$0xff] }
 0x6a4   :  { %v1211_v2 = vpop.permute.xlu1 %1210  ;;  %v1100_v3 = vadd.f32 %v1098_v0, %v3339_v62  ;;  %v2914_v0 = vpack.c.bf16 %v1359_v63, %v1358_v61 }
 0x6a5   :  { %v1223_v5 = vmul.f32 0.2, %v1221_v1  ;;  %v1218_v6 = vadd.f32 %v1216_v56, %v1211_v2  ;;  %v1360_v1 = vld [vmem:[%s3522_s11 + $0x10] sm:$0xff]  ;;  %v1361_v2 = vld [vmem:[%s3522_s11 + $0x18] sm:$0xff] }
 0x6a6   :  { %v1102_v7 = vsel %vm77_vm0, %v1100_v3, -inf  ;;  %2915 = vmatprep.subr.bf16.mxu1 %v2914_v0 }
 0x6a7   :  { %v1222_v8 = vmin.f32 %v1218_v6, 0.0  ;;  %1103 = vmax.xlane.f32.xlu1 %v1102_v7  ;;  %v1225_v9 = vadd.f32 %v1223_v5, %v1219_v4  ;;  %v1220_v10 = vmax.f32 %v1218_v6, 0.0  ;;  %2917 = vmatpush3.bf16.msra.mxu1 %v2914_v0  ;;  %v1362_v5 = vld [vmem:[%s3523_s12] sm:$0xff]  ;;  %v1363_v6 = vld [vmem:[%s3523_s12 + $0x8] sm:$0xff]  ;;  %v1364_v7 = vld [vmem:[%s3523_s12 + $0x10] sm:$0xff] }
 0x6a9   :  { %v1224_v11 = vmul.f32 0.2, %v1222_v8  ;;  %v1227_v12 = vadd.f32 %v1225_v9, %v3339_v62  ;;  %v2922_v9 = vpack.c.bf16 %v1363_v6, %v1362_v5 }
 0x6ab   :  { %v1229_v13 = vsel %vm77_vm0, %v1227_v12, -inf  ;;  %v1226_v14 = vadd.f32 %v1224_v11, %v1220_v10  ;;  %v1365_v10 = vld [vmem:[%s3523_s12 + $0x18] sm:$0xff] }
 0x6ac   :  { %1230 = vmax.xlane.f32.xlu1 %v1229_v13  ;;  %v2926_v11 = vpack.c.bf16 %v1365_v10, %v1364_v7 }
 0x6ad   :  { %v1228_v15 = vadd.f32 %v1226_v14, %v3332_v53  ;;  %v1366_v14 = vld [vmem:[%s3524_s13] sm:$0xff] }
 0x6af   :  { %v1232_v16 = vsel %vm77_vm0, %v1228_v15, -inf }
 0x6b0   :  { %1233 = vmax.xlane.f32.xlu1 %v1232_v16 }
 0x730   :  { %v1107_v17 = vpop.xlane.xlu0 %1106 }
 0x731   :  { %v1109_v18 = vsub.f32 %v1101_v60, %v1107_v17 }
 0x733   :  { %v1112_v19 = vmul.f32 1.442695, %v1109_v18 }
 0x734   :  { %v1104_v20 = vpop.xlane.xlu1 %1103 }
 0x735   :  { %2996 = vpow2.f32 %v1112_v19  ;;  %v1108_v22 = vsub.f32 %v1100_v3, %v1104_v20  ;;  %v2918_v3 = vpack.c.bf16 %v1361_v2, %v1360_v1 }
 0x737   :  { %v1110_v27 = vmul.f32 1.442695, %v1108_v22  ;;  %2919 = vmatprep.subr.bf16.mxu1 %v2918_v3 }
 0x738   :  { %2921 = vmatpush3.bf16.msra.mxu1 %v2918_v3 }
 0x739   :  { %v1231_v21 = vpop.xlane.xlu1 %1230  ;;  %2930 = vmatprep.subr.bf16.mxu1 %v3053_v24 }
 0x73a   :  { %v1235_v33 = vsub.f32 %v1227_v12, %v1231_v21 }
 0x73c   :  { %v1237_v37 = vmul.f32 1.442695, %v1235_v33 }
 0x73d   :  { %v1234_v23 = vpop.xlane.xlu1 %1233 }
 0x73e   :  { %v1236_v25 = vsub.f32 %v1228_v15, %v1234_v23  ;;  %v2522_v15 = vld [vmem:[%s3525_s10] ss:$0 sm:$0xff] }
 0x73f   :  { %v2997_v26 = vpop.eup %2996 }
 0x740   :  { %v1239_v35 = vmul.f32 1.442695, %v1236_v25  ;;  %v1117_v36 = vsel %vm77_vm0, %v2997_v26, 0.0  ;;  %v1367_v25 = vld [vmem:[%s3524_s13 + $0x8] sm:$0xff] }
 0x741   :  { %1118 = vadd.xlane.f32.xlu1 %v1117_v36 }
 0x742   :  { %2998 = vpow2.f32 %v1239_v35 }
 0x743   :  { %3000 = vpow2.f32 %v1110_v27  ;;  %v1369_v27 = vld [vmem:[%s3524_s13 + $0x18] sm:$0xff] }
 0x744   :  { %3002 = vpow2.f32 %v1237_v37 }
 0x74c   :  { %v2999_v38 = vpop.eup %2998 }
 0x74d   :  { %v1244_v40 = vsel %vm77_vm0, %v2999_v38, 0.0  ;;  %v3001_v41 = vpop.eup %3000 }
 0x74e   :  { %1245 = vadd.xlane.f32.xlu1 %v1244_v40  ;;  %v1114_v42 = vsel %vm77_vm0, %v3001_v41, 0.0  ;;  %v3003_v44 = vpop.eup %3002 }
 0x74f   :  { %v1241_v45 = vsel %vm77_vm0, %v3003_v44, 0.0 }
 0x752   :  { %1115 = vadd.xlane.f32.xlu1 %v1114_v42 }
 0x756   :  { %1242 = vadd.xlane.f32.xlu1 %v1241_v45 }
 0x767   :  { %2978 = vrot.lane.b32.xlu1 %v2977_v32, %s3058_s2 }
 0x7ce   :  { %v1119_v46 = vpop.xlane.xlu1 %1118 }
 0x7cf   :  { %3004 = vrcp.f32 %v1119_v46 }
 0x7d9   :  { %v3005_v55 = vpop.eup %3004 }
 0x7da   :  { %v1123_v59 = vmul.f32 %v3005_v55, %v2997_v26  ;;  %v1368_v26 = vld [vmem:[%s3524_s13 + $0x10] sm:$0xff] }
 0x7db   :  { %v1246_v47 = vpop.xlane.xlu1 %1245 }
 0x7df   :  { %v1116_v49 = vpop.xlane.xlu1 %1115 }
 0x7e0   :  { %3006 = vrcp.f32 %v1116_v49 }
 0x7e1   :  { %3008 = vrcp.f32 %v1246_v47 }
 0x7e3   :  { %v1243_v50 = vpop.xlane.xlu1 %1242 }
 0x7e4   :  { %3010 = vrcp.f32 %v1243_v50 }
 0x7e7   :  { %v2979_v51 = vpop.permute.xlu1 %2978 }
 0x7e8   :  { %v2981_v52 = vunpack.i.h.bf16 %v2979_v51  ;;  %v2980_v54 = vunpack.i.l.bf16 %v2979_v51 }
 0x7ea   :  { %v3007_v56 = vpop.eup %3006  ;;  %v2910_v57 = vpack.c.bf16 %v2981_v52, %v2980_v54 }
 0x7eb   :  { %v1122_v58 = vmul.f32 %v3007_v56, %v3001_v41  ;;  %v3009_v60 = vpop.eup %3008 }
 0x7ec   :  { %2911 = vmatprep.subr.bf16.mxu0 %v2910_v57  ;;  %v1250_v32 = vmul.f32 %v3009_v60, %v2999_v38 }
 0x7ed   :  { %2752 = vmatprep.mubr.msk.f32.mxu0 %vm77_vm0, %v1122_v58 }
 0x7ee   :  { %v3011_v29 = vpop.eup %3010  ;;  %2753 = vmatmul.mubr.msk.f32.vlgmr.msra.gmra.mrb[10].mxu0 %vm77_vm0, %v1123_v59 }
 0x7ef   :  { %2913 = vmatpush3.bf16.msra.mxu0 %v2910_v57  ;;  %v1249_v30 = vmul.f32 %v3011_v29, %v3003_v44 }
 0x7f0   :  { %2923 = vmatprep.subr.bf16.mxu0 %v2922_v9 }
 0x7f1   :  { %2759 = vmatprep.mubr.msk.f32.mxu0 %vm77_vm0, %v1249_v30 }
 0x7f2   :  { %2760 = vmatmul.mubr.msk.f32.vlgmr.msra.gmra.mrb[12].mxu0 %vm77_vm0, %v1250_v32 }
 0x7f3   :  { %2925 = vmatpush3.bf16.msra.mxu0 %v2922_v9 }
 0x7f4   :  { %2927 = vmatprep.subr.bf16.mxu0 %v2926_v11 }
 0x7f7   :  { %2929 = vmatpush3.bf16.msra.mxu0 %v2926_v11 }
 0x8c1   :  { %v2754_v4 = vpop.f32.mrb[10].mxu0 }
 0x8c2   :  { %v1196_v8 = vpop.f32.mrb[11].mxu0 }
 0x8c5   :  { %v2761_v12 = vpop.f32.mrb[12].mxu0 }
 0x8c6   :  { %1342 = vrot.lane.b32.xlu1 %v2761_v12, %s3049_s28  ;;  %v1329_v13 = vpop.f32.mrb[13].mxu0 }
 0x8c7   :  { %1340 = vrot.lane.b32.xlu0 %v1329_v13, %s3049_s28 }
 0x8ef   :  { %1533 = vxpose.xlu1.b32.start [1/4] (short) (narrow) %v1366_v14, 8 }
 0x8f3   :  { %1534 = vxpose.xlu1.b32.cont [2/4] (short) (narrow) %v1367_v25, 8 }
 0x8f7   :  { %1535 = vxpose.xlu1.b32.cont [3/4] (short) (narrow) %v1368_v26, 8 }
 0x8fb   :  { %1536 = vxpose.xlu1.b32.end [4/4] (short) (narrow) %v1369_v27, 8 }
 0x919   :  { %2989 = vset.pattern.permute.xlu1 %v3054_v28 }
 0x938   :  { %v1343_v16 = vpop.permute.xlu1 %1342 }
 0x939   :  { %v1347_v17 = vsel %vm77_vm0, %v2754_v4, %v1343_v16  ;;  %v1341_v18 = vpop.permute.xlu0 %1340 }
 0x93a   :  { %v1355_v19 = vadd.f32 %v2522_v15, %v1347_v17  ;;  %v1346_v20 = vsel %vm77_vm0, %v1196_v8, %v1341_v18 }
 0x93b   :  { %v1354_v21 = vadd.f32 %v2522_v15, %v1346_v20 }
 0x93c   :  { %v1357_v23 = vmax.f32 %v1355_v19, 0.0 }
 0x93d   :  { %v1356_v22 = vmax.f32 %v1354_v21, 0.0 }
 0x93f   :  { %2770 = vmatprep.mubr.msk.f32.mxu1 %vm359_vm3, %v1356_v22 }
 0x940   :  { %2771 = vmatmul.mubr.msk.f32.vlgmr.msra.gmra.mrb[12].mxu1 %vm359_vm3, %v1357_v23 }
 0x941   :  { %2788 = vmatprep.mubr.msk.f32.mxu1 %vm3055_vm7, %v3056_v34 }
 0x96f   :  { %v1549_v28 = vpop.trf.xlu1 }
 0xa13   :  { %v3409_v33 = vpop.f32.mrb[12].mxu1 }
 0xa14   :  { %v3411_v35 = vpop.f32.mrb[13].mxu1 }
 0xa15   :  { %v2984_v36 = vpack.i.bf16 %v3409_v33, %v3411_v35  ;;  %v2931_v37 = vpack.c.bf16 %v3409_v33, %v3411_v35  ;;  %2781 = vmatprep.mubr.msk.f32.mxu0 %vm359_vm3, %v3411_v35 }
 0xa16   :  { %2782 = vmatmul.mubr.msk.f32.vlgmr.msra.gmra.mrb[14].mxu0 %vm359_vm3, %v3409_v33 }
 0xa17   :  { %2933 = vmatpush3.bf16.xpose.msk.msra.mxu1 %vm3306_vm6, %v2931_v37  ;;  %2935 = vmatprep.subr.bf16.mxu0 %v2931_v37 }
 0xa18   :  { %2937 = vmatpush3.bf16.msra.mxu0 %v2931_v37 }
 0xa1e   :  { %2789 = vmatmul.mubr.msk.f32.vlgmr.msra.gmra.mrb[14].mxu1 %vm359_vm3, %v1549_v28 }
 0xae9   :  { %v2783_v38 = vpop.f32.mrb[14].mxu0 }
 0xaea   :  { %1645 = vperm.xlu0 %2982, %v2783_v38   ;;  %v1524_v40 = vpop.f32.mrb[15].mxu0 }
 0xaee   :  { %1640 = vperm.xlu0 %2982, %v1524_v40  }
 0xaf1   :  { %v1634_v41 = vpop.f32.mrb[14].mxu1 }
 0xaf2   :  { %2983 = vset.pattern.permute.xlu0 %v3057_v39  ;;  %v2790_v42 = vpop.f32.mrb[15].mxu1  ;;  %v1651_v44 = vrot.slane %v1634_v41, %v3324_v43  ;;  %v1778_v55 = vrot.slane %v1634_v41, %v3327_v48 }
 0xaf3   :  { %1768 = vperm.xlu0 %2983, %v1524_v40  }
 0xaf7   :  { %1772 = vperm.xlu0 %2983, %v2783_v38  }
 0xb69   :  { %v1646_v45 = vpop.permute.xlu0 %1645 }
 0xb6a   :  { %v1653_v31 = vadd.f32 %v1651_v44, %v1646_v45 }
 0xb6c   :  { %v1657_v46 = vmin.f32 %v1653_v31, 0.0  ;;  %v1655_v49 = vmax.f32 %v1653_v31, 0.0 }
 0xb6d   :  { %v1641_v47 = vpop.permute.xlu0 %1640 }
 0xb6e   :  { %v1659_v50 = vmul.f32 0.2, %v1657_v46  ;;  %v1652_v51 = vadd.f32 %v1651_v44, %v1641_v47 }
 0xb70   :  { %v1656_v52 = vmin.f32 %v1652_v51, 0.0  ;;  %v1661_v54 = vadd.f32 %v1659_v50, %v1655_v49  ;;  %v1654_v56 = vmax.f32 %v1652_v51, 0.0 }
 0xb72   :  { %v1658_v57 = vmul.f32 0.2, %v1656_v52  ;;  %v1769_v58 = vpop.permute.xlu0 %1768  ;;  %v1663_v59 = vadd.f32 %v1661_v54, %v3332_v53 }
 0xb73   :  { %v1779_v60 = vadd.f32 %v1778_v55, %v1769_v58  ;;  %v1920_v58 = vld [vmem:[%s3526_s15] sm:$0xff] }
 0xb74   :  { %v1667_v29 = vsel %vm77_vm0, %v1663_v59, -inf  ;;  %v1660_v30 = vadd.f32 %v1658_v57, %v1654_v56 }
 0xb75   :  { %v1783_v32 = vmin.f32 %v1779_v60, 0.0  ;;  %1668 = vmax.xlane.f32.xlu1 %v1667_v29  ;;  %v1781_v0 = vmax.f32 %v1779_v60, 0.0  ;;  %v1922_v29 = vld [vmem:[%s3526_s15 + $0x10] sm:$0xff] }
 0xb76   :  { %v1773_v61 = vpop.permute.xlu0 %1772  ;;  %v1662_v63 = vadd.f32 %v1660_v30, %v3339_v62  ;;  %v1923_v30 = vld [vmem:[%s3526_s15 + $0x18] sm:$0xff] }
 0xb77   :  { %v1785_v1 = vmul.f32 0.2, %v1783_v32  ;;  %v1780_v2 = vadd.f32 %v1778_v55, %v1773_v61  ;;  %v2946_v32 = vpack.c.bf16 %v1923_v30, %v1922_v29 }
 0xb78   :  { %v1664_v3 = vsel %vm77_vm0, %v1662_v63, -inf }
 0xb79   :  { %v1784_v4 = vmin.f32 %v1780_v2, 0.0  ;;  %1665 = vmax.xlane.f32.xlu0 %v1664_v3  ;;  %v1787_v5 = vadd.f32 %v1785_v1, %v1781_v0  ;;  %v1782_v6 = vmax.f32 %v1780_v2, 0.0  ;;  %v1924_v0 = vld [vmem:[%s3527_s16] sm:$0xff]  ;;  %s3060_s16 = smov 4  }
 0xb7a   :  { %v1925_v1 = vld [vmem:[%s3528_s17] sm:$0xff] }
 0xb7b   :  { %v1786_v7 = vmul.f32 0.2, %v1784_v4  ;;  %v1789_v8 = vadd.f32 %v1787_v5, %v3339_v62  ;;  %v2534_v4 = vld [vmem:[%s3529_s14] ss:$0 sm:$0xff]  ;;  %s3059_s14 = smov 124  }
 0xb7d   :  { %v1791_v9 = vsel %vm77_vm0, %v1789_v8, -inf  ;;  %v1788_v10 = vadd.f32 %v1786_v7, %v1782_v6 }
 0xb7e   :  { %1792 = vmax.xlane.f32.xlu0 %v1791_v9 }
 0xb7f   :  { %v1790_v11 = vadd.f32 %v1788_v10, %v3332_v53 }
 0xb81   :  { %v1794_v12 = vsel %vm77_vm0, %v1790_v11, -inf }
 0xb82   :  { %1795 = vmax.xlane.f32.xlu0 %v1794_v12 }
 0xc02   :  { %v1669_v13 = vpop.xlane.xlu1 %1668 }
 0xc03   :  { %v1671_v14 = vsub.f32 %v1663_v59, %v1669_v13  ;;  %v1921_v59 = vld [vmem:[%s3526_s15 + $0x8] sm:$0xff] }
 0xc04   :  { %v2942_v60 = vpack.c.bf16 %v1921_v59, %v1920_v58 }
 0xc05   :  { %v1674_v15 = vmul.f32 1.442695, %v1671_v14 }
 0xc06   :  { %v1666_v16 = vpop.xlane.xlu0 %1665  ;;  %2943 = vmatprep.subr.bf16.mxu1 %v2942_v60 }
 0xc07   :  { %3012 = vpow2.f32 %v1674_v15  ;;  %v1670_v18 = vsub.f32 %v1662_v63, %v1666_v16  ;;  %2945 = vmatpush3.bf16.msra.mxu1 %v2942_v60 }
 0xc08   :  { %2947 = vmatprep.subr.bf16.mxu1 %v2946_v32 }
 0xc09   :  { %v1672_v22 = vmul.f32 1.442695, %v1670_v18 }
 0xc0b   :  { %v1793_v17 = vpop.xlane.xlu0 %1792  ;;  %2949 = vmatpush3.bf16.msra.mxu1 %v2946_v32 }
 0xc0c   :  { %v1797_v23 = vsub.f32 %v1789_v8, %v1793_v17 }
 0xc0e   :  { %v1799_v27 = vmul.f32 1.442695, %v1797_v23 }
 0xc0f   :  { %v1796_v19 = vpop.xlane.xlu0 %1795 }
 0xc10   :  { %v1798_v20 = vsub.f32 %v1790_v11, %v1796_v19 }
 0xc11   :  { %v3013_v21 = vpop.eup %3012 }
 0xc12   :  { %v1801_v25 = vmul.f32 1.442695, %v1798_v20  ;;  %v1679_v26 = vsel %vm77_vm0, %v3013_v21, 0.0 }
 0xc13   :  { %1680 = vadd.xlane.f32.xlu0 %v1679_v26 }
 0xc14   :  { %3014 = vpow2.f32 %v1801_v25 }
 0xc15   :  { %3016 = vpow2.f32 %v1672_v22 }
 0xc16   :  { %3018 = vpow2.f32 %v1799_v27 }
 0xc1e   :  { %v3015_v37 = vpop.eup %3014 }
 0xc1f   :  { %v1806_v28 = vsel %vm77_vm0, %v3015_v37, 0.0  ;;  %v3017_v38 = vpop.eup %3016 }
 0xc20   :  { %1807 = vadd.xlane.f32.xlu0 %v1806_v28  ;;  %v1676_v40 = vsel %vm77_vm0, %v3017_v38, 0.0  ;;  %v3019_v41 = vpop.eup %3018 }
 0xc21   :  { %v1803_v42 = vsel %vm77_vm0, %v3019_v41, 0.0 }
 0xc24   :  { %1677 = vadd.xlane.f32.xlu0 %v1676_v40 }
 0xc28   :  { %1804 = vadd.xlane.f32.xlu0 %v1803_v42 }
 0xc3e   :  { %2985 = vrot.lane.b32.xlu0 %v2984_v36, %s3058_s2 }
 0xc5c   :  { %2089 = vxpose.xlu0.b32.start.end [1/1] (short) (narrow) %v1925_v1, 8 }
 0xca0   :  { %v1681_v44 = vpop.xlane.xlu0 %1680 }
 0xca1   :  { %3020 = vrcp.f32 %v1681_v44 }
 0xcab   :  { %v3021_v51 = vpop.eup %3020 }
 0xcac   :  { %v1685_v56 = vmul.f32 %v3021_v51, %v3013_v21 }
 0xcad   :  { %v1808_v45 = vpop.xlane.xlu0 %1807 }
 0xcb1   :  { %v1678_v31 = vpop.xlane.xlu0 %1677 }
 0xcb2   :  { %3022 = vrcp.f32 %v1678_v31 }
 0xcb3   :  { %3024 = vrcp.f32 %v1808_v45 }
 0xcb5   :  { %v1805_v46 = vpop.xlane.xlu0 %1804 }
 0xcb6   :  { %3026 = vrcp.f32 %v1805_v46 }
 0xcb9   :  { %v2986_v47 = vpop.permute.xlu0 %2985 }
 0xcba   :  { %v2988_v49 = vunpack.i.h.bf16 %v2986_v47  ;;  %v2987_v50 = vunpack.i.l.bf16 %v2986_v47 }
 0xcbc   :  { %v3023_v52 = vpop.eup %3022  ;;  %v2938_v54 = vpack.c.bf16 %v2988_v49, %v2987_v50 }
 0xcbd   :  { %v1684_v55 = vmul.f32 %v3023_v52, %v3017_v38  ;;  %v3025_v57 = vpop.eup %3024 }
 0xcbe   :  { %2939 = vmatprep.subr.bf16.mxu0 %v2938_v54  ;;  %v1812_v36 = vmul.f32 %v3025_v57, %v3015_v37 }
 0xcbf   :  { %2795 = vmatprep.mubr.msk.f32.mxu0 %vm77_vm0, %v1684_v55 }
 0xcc0   :  { %v3027_v33 = vpop.eup %3026  ;;  %2796 = vmatmul.mubr.msk.f32.vlgmr.msra.gmra.mrb[16].mxu0 %vm77_vm0, %v1685_v56 }
 0xcc1   :  { %2941 = vmatpush3.bf16.msra.mxu0 %v2938_v54  ;;  %v1811_v35 = vmul.f32 %v3027_v33, %v3019_v41 }
 0xcc2   :  { %2816 = vmatprep.subr.mxu0 %v1924_v0 }
 0xcc3   :  { %2802 = vmatprep.mubr.msk.f32.mxu0 %vm77_vm0, %v1811_v35 }
 0xcc4   :  { %2803 = vmatmul.mubr.msk.f32.vlgmr.msra.gmra.mrb[18].mxu0 %vm77_vm0, %v1812_v36 }
 0xcc5   :  { %2817 = vmatpush3.msra.mxu0 %v1924_v0 }
 0xcc6   :  { %2950 = vmatprep.subr.bf16.mxu0 %v3053_v24 }
 0xcdc   :  { %v2105_v16 = vpop.trf.xlu0 }
 0xd93   :  { %v2797_v61 = vpop.f32.mrb[16].mxu0 }
 0xd94   :  { %v1758_v63 = vpop.f32.mrb[17].mxu0 }
 0xd97   :  { %v2804_v2 = vpop.f32.mrb[18].mxu0 }
 0xd98   :  { %v1891_v3 = vpop.f32.mrb[19].mxu0 }
 0xd99   :  { %1902 = vrot.lane.b32.xlu1 %v1891_v3, %s3049_s28 }
 0xd9d   :  { %1904 = vrot.lane.b32.xlu1 %v2804_v2, %s3049_s28 }
 0xe0b   :  { %v1903_v5 = vpop.permute.xlu1 %1902 }
 0xe0c   :  { %v1908_v6 = vsel %vm77_vm0, %v1758_v63, %v1903_v5 }
 0xe0d   :  { %v1916_v7 = vadd.f32 %v2534_v4, %v1908_v6 }
 0xe0f   :  { %v1918_v8 = vmax.f32 %v1916_v7, 0.0  ;;  %v1905_v9 = vpop.permute.xlu1 %1904 }
 0xe10   :  { %v1909_v10 = vsel %vm77_vm0, %v2797_v61, %v1905_v9 }
 0xe11   :  { %v1917_v11 = vadd.f32 %v2534_v4, %v1909_v10  ;;  %2813 = vmatprep.mubr.msk.f32.mxu1 %vm359_vm3, %v1918_v8 }
 0xe13   :  { %v1919_v12 = vmax.f32 %v1917_v11, 0.0 }
 0xe15   :  { %2814 = vmatmul.mubr.msk.f32.vlgmr.msra.gmra.mrb[16].mxu1 %vm359_vm3, %v1919_v12 }
 0xee8   :  { %v2815_v24 = vpop.f32.mrb[16].mxu1 }
 0xee9   :  { %v1999_v13 = vpop.f32.mrb[17].mxu1 }
 0xeea   :  { %v2991_v14 = vpack.i.bf16 %v2815_v24, %v1999_v13  ;;  %v2951_v15 = vpack.c.bf16 %v2815_v24, %v1999_v13  ;;  %2818 = vmatprep.mubr.msk.f32.mxu0 %vm345_vm1, %v1999_v13 }
 0xeeb   :  { %2819 = vmatmul.mubr.msk.f32.vlgmr.msra.gmra.mrb[20].mxu0 %vm345_vm1, %v2815_v24 }
 0xeec   :  { %2953 = vmatpush3.bf16.xpose.msk.msra.mxu0 %vm2952_vm8, %v2951_v15  ;;  %2955 = vmatprep.subr.bf16.mxu1 %v2951_v15 }
 0xeed   :  { %2957 = vmatpush3.bf16.msra.mxu1 %v2951_v15  ;;  %2825 = vmatprep.mubr.msk.f32.mxu0 %vm3055_vm7, %v3056_v34 }
 0xef3   :  { %2826 = vmatmul.mubr.msk.f32.vlgmr.msra.gmra.mrb[22].mxu0 %vm345_vm1, %v2105_v16 }
 0xfbe   :  { %v2820_v17 = vpop.f32.mrb[20].mxu0 }
 0xfbf   :  { %2201 = vperm.xlu1 %2989, %v2820_v17   ;;  %v2080_v18 = vpop.f32.mrb[21].mxu0 }
 0xfc3   :  { %2196 = vperm.xlu1 %2989, %v2080_v18  }
 0xfc6   :  { %v2190_v19 = vpop.f32.mrb[22].mxu0 }
 0xfc7   :  { %2990 = vset.pattern.permute.xlu1 %v3057_v39  ;;  %v2827_v20 = vpop.f32.mrb[23].mxu0  ;;  %v2207_v21 = vrot.slane %v2190_v19, %v3324_v43  ;;  %v2334_v40 = vrot.slane %v2190_v19, %v3327_v48 }
 0xfc8   :  { %2324 = vperm.xlu1 %2990, %v2080_v18  }
 0xfcc   :  { %2328 = vperm.xlu1 %2990, %v2820_v17  }
0x103e   :  { %v2202_v22 = vpop.permute.xlu1 %2201 }
0x103f   :  { %v2209_v23 = vadd.f32 %v2207_v21, %v2202_v22 }
0x1041   :  { %v2213_v25 = vmin.f32 %v2209_v23, 0.0  ;;  %v2211_v34 = vmax.f32 %v2209_v23, 0.0 }
0x1042   :  { %v2197_v26 = vpop.permute.xlu1 %2196 }
0x1043   :  { %v2215_v27 = vmul.f32 0.2, %v2213_v25  ;;  %v2208_v37 = vadd.f32 %v2207_v21, %v2197_v26 }
0x1045   :  { %v2212_v28 = vmin.f32 %v2208_v37, 0.0  ;;  %v2217_v38 = vadd.f32 %v2215_v27, %v2211_v34  ;;  %v2210_v41 = vmax.f32 %v2208_v37, 0.0 }
0x1047   :  { %v2214_v42 = vmul.f32 0.2, %v2212_v28  ;;  %v2325_v44 = vpop.permute.xlu1 %2324  ;;  %v2219_v39 = vadd.f32 %v2217_v38, %v3332_v53 }
0x1048   :  { %v2335_v45 = vadd.f32 %v2334_v40, %v2325_v44 }
0x1049   :  { %v2223_v31 = vsel %vm77_vm0, %v2219_v39, -inf  ;;  %v2216_v43 = vadd.f32 %v2214_v42, %v2210_v41 }
0x104a   :  { %v2339_v46 = vmin.f32 %v2335_v45, 0.0  ;;  %2224 = vmax.xlane.f32.xlu0 %v2223_v31  ;;  %v2337_v50 = vmax.f32 %v2335_v45, 0.0 }
0x104b   :  { %v2329_v47 = vpop.permute.xlu1 %2328  ;;  %v2218_v49 = vadd.f32 %v2216_v43, %v3339_v62 }
0x104c   :  { %v2341_v51 = vmul.f32 0.2, %v2339_v46  ;;  %v2336_v52 = vadd.f32 %v2334_v40, %v2329_v47  ;;  %v2546_v40 = vld [vmem:[%s3530_s18] ss:$0 sm:$0xff] }
0x104d   :  { %v2220_v54 = vsel %vm77_vm0, %v2218_v49, -inf }
0x104e   :  { %v2340_v48 = vmin.f32 %v2336_v52, 0.0  ;;  %2221 = vmax.xlane.f32.xlu1 %v2220_v54  ;;  %v2343_v55 = vadd.f32 %v2341_v51, %v2337_v50  ;;  %v2338_v56 = vmax.f32 %v2336_v52, 0.0 }
0x1050   :  { %v2342_v57 = vmul.f32 0.2, %v2340_v48  ;;  %v2345_v33 = vadd.f32 %v2343_v55, %v3339_v62 }
0x1052   :  { %v2347_v35 = vsel %vm77_vm0, %v2345_v33, -inf  ;;  %v2344_v36 = vadd.f32 %v2342_v57, %v2338_v56 }
0x1053   :  { %2348 = vmax.xlane.f32.xlu1 %v2347_v35 }
0x1054   :  { %v2346_v58 = vadd.f32 %v2344_v36, %v3332_v53 }
0x1056   :  { %v2350_v59 = vsel %vm77_vm0, %v2346_v58, -inf }
0x1057   :  { %2351 = vmax.xlane.f32.xlu1 %v2350_v59 }
0x1060   :  { %2992 = vrot.lane.b32.xlu0 %v2991_v14, %s3059_s14 }
0x10d7   :  { %v2225_v60 = vpop.xlane.xlu0 %2224 }
0x10d8   :  { %v2227_v29 = vsub.f32 %v2219_v39, %v2225_v60 }
0x10da   :  { %v2230_v30 = vmul.f32 1.442695, %v2227_v29 }
0x10db   :  { %v2993_v32 = vpop.permute.xlu0 %2992  ;;  %v2222_v61 = vpop.xlane.xlu1 %2221 }
0x10dc   :  { %3028 = vpow2.f32 %v2230_v30  ;;  %v2995_v63 = vunpack.i.h.bf16 %v2993_v32  ;;  %v2994_v0 = vunpack.i.l.bf16 %v2993_v32  ;;  %v2226_v62 = vsub.f32 %v2218_v49, %v2222_v61 }
0x10de   :  { %v2958_v1 = vpack.c.bf16 %v2995_v63, %v2994_v0  ;;  %v2228_v2 = vmul.f32 1.442695, %v2226_v62 }
0x10e0   :  { %3030 = vpow2.f32 %v2228_v2  ;;  %2959 = vmatprep.subr.bf16.mxu1 %v2958_v1  ;;  %v2349_v3 = vpop.xlane.xlu1 %2348 }
0x10e1   :  { %v2353_v53 = vsub.f32 %v2345_v33, %v2349_v3 }
0x10e3   :  { %v2355_v4 = vmul.f32 1.442695, %v2353_v53 }
0x10e4   :  { %v2352_v5 = vpop.xlane.xlu1 %2351 }
0x10e5   :  { %3032 = vpow2.f32 %v2355_v4  ;;  %v2354_v6 = vsub.f32 %v2346_v58, %v2352_v5 }
0x10e6   :  { %v3029_v7 = vpop.eup %3028 }
0x10e7   :  { %v2357_v8 = vmul.f32 1.442695, %v2354_v6  ;;  %v2235_v9 = vsel %vm77_vm0, %v3029_v7, 0.0 }
0x10e8   :  { %2236 = vadd.xlane.f32.xlu1 %v2235_v9 }
0x10e9   :  { %3034 = vpow2.f32 %v2357_v8 }
0x10ea   :  { %v3031_v10 = vpop.eup %3030 }
0x10eb   :  { %v2232_v11 = vsel %vm77_vm0, %v3031_v10, 0.0 }
0x10ec   :  { %2233 = vadd.xlane.f32.xlu1 %v2232_v11 }
0x10ef   :  { %v3033_v12 = vpop.eup %3032 }
0x10f0   :  { %v2359_v24 = vsel %vm77_vm0, %v3033_v12, 0.0 }
0x10f1   :  { %2360 = vadd.xlane.f32.xlu1 %v2359_v24 }
0x10f3   :  { %v3035_v13 = vpop.eup %3034 }
0x10f4   :  { %v2362_v14 = vsel %vm77_vm0, %v3035_v13, 0.0 }
0x10f5   :  { %2363 = vadd.xlane.f32.xlu1 %v2362_v14 }
0x1175   :  { %v2237_v15 = vpop.xlane.xlu1 %2236 }
0x1176   :  { %3036 = vrcp.f32 %v2237_v15 }
0x1179   :  { %v2234_v16 = vpop.xlane.xlu1 %2233 }
0x117a   :  { %3038 = vrcp.f32 %v2234_v16 }
0x117e   :  { %v2361_v17 = vpop.xlane.xlu1 %2360 }
0x117f   :  { %3040 = vrcp.f32 %v2361_v17 }
0x1180   :  { %v3037_v19 = vpop.eup %3036 }
0x1181   :  { %v2241_v22 = vmul.f32 %v3037_v19, %v3029_v7 }
0x1182   :  { %v2364_v18 = vpop.xlane.xlu1 %2363 }
0x1183   :  { %3042 = vrcp.f32 %v2364_v18 }
0x1184   :  { %v3039_v20 = vpop.eup %3038 }
0x1185   :  { %v2240_v21 = vmul.f32 %v3039_v20, %v3031_v10 }
0x1187   :  { %2832 = vmatprep.mubr.msk.f32.mxu1 %vm77_vm0, %v2240_v21 }
0x1188   :  { %2833 = vmatmul.mubr.msk.f32.vlgmr.msra.gmra.mrb[18].mxu1 %vm77_vm0, %v2241_v22 }
0x1189   :  { %v3041_v23 = vpop.eup %3040  ;;  %2961 = vmatpush3.bf16.msra.mxu1 %v2958_v1 }
0x118a   :  { %v2367_v25 = vmul.f32 %v3041_v23, %v3033_v12 }
0x118c   :  { %2839 = vmatprep.mubr.msk.f32.mxu1 %vm77_vm0, %v2367_v25 }
0x118d   :  { %v3043_v26 = vpop.eup %3042 }
0x118e   :  { %v2368_v34 = vmul.f32 %v3043_v26, %v3035_v13 }
0x1190   :  { %2840 = vmatmul.mubr.msk.f32.vlgmr.msra.gmra.mrb[20].mxu1 %vm77_vm0, %v2368_v34 }
0x125b   :  { %v2834_v27 = vpop.f32.mrb[18].mxu1 }
0x125c   :  { %v2314_v37 = vpop.f32.mrb[19].mxu1 }
0x1263   :  { %v2841_v28 = vpop.f32.mrb[20].mxu1 }
0x1264   :  { %v2447_v38 = vpop.f32.mrb[21].mxu1 }
0x1265   :  { %2458 = vrot.lane.b32.xlu1 %v2447_v38, %s3060_s16 }
0x1269   :  { %2460 = vrot.lane.b32.xlu1 %v2841_v28, %s3060_s16 }
0x12d7   :  { %v2459_v41 = vpop.permute.xlu1 %2458 }
0x12d8   :  { %v2465_v42 = vsel %vm2464_vm9, %v2314_v37, %v2459_v41 }
0x12d9   :  { %v2473_v44 = vadd.f32 %v2546_v40, %v2465_v42 }
0x12db   :  { %v2461_v39 = vpop.permute.xlu1 %2460  ;;  %v2475_v45 = vsel %vm345_vm1, %v2473_v44, 0.0 }
0x12dc   :  { %v2466_v31 = vsel %vm2464_vm9, %v2834_v27, %v2461_v39  ;;  %2476 = vadd.xlane.f32.xlu0 %v2475_v45 }
0x12dd   :  { %v2474_v43 = vadd.f32 %v2546_v40, %v2466_v31 }
0x12df   :  { %v2478_v46 = vsel %vm345_vm1, %v2474_v43, 0.0 }
0x12e0   :  { %2479 = vadd.xlane.f32.xlu1 %v2478_v46 }
0x1369   :  { %v2477_v47 = vpop.xlane.xlu0 %2476 }
0x136a   :  { %v2482_v49 = vmul.f32 0.125, %v2477_v47 }
0x136c   :  { %3044 = vtanh.f32 %v2482_v49 }
0x136d   :  { %v2480_v50 = vpop.xlane.xlu1 %2479 }
0x136e   :  { %v2483_v51 = vmul.f32 0.125, %v2480_v50 }
0x1370   :  { %3046 = vtanh.f32 %v2483_v51 }
0x1376   :  { %v3045_v52 = vpop.eup %3044 }
0x1377   :  { %2487 = vst.msk [vmem:[%s3531_s19] sm:$0xff] %vm2486_vm10, %v3045_v52 }
0x137a   :  { %v3047_v54 = vpop.eup %3046 }
0x137b   :  { %2488 = vst.msk [vmem:[%s3531_s19 + $0x8] sm:$0xff] %vm2486_vm10, %v3047_v54 }

</bundles_post_ra>
